<compile_context>
chip_gen: v7x
topology: tpu7x:2x2x1
jax: 0.10.0
libtpu: 0.0.40
codegen_flags: <defaults>
</compile_context>

<pallas_src>
import functools
import math

import jax
import jax.numpy as jnp
from jax.experimental import pallas as pl
from jax.experimental.pallas import tpu as pltpu

# ----------------------------- configuration --------------------------------
IMG = 16              # opt.res (small, synthetic)
PATCH = 8
IN_CH = 3
EMBED = 64
DEPTH = 2
HEADS = 4
MLP_HIDDEN = EMBED * 4
NUM_CLASSES = 8
NUM_CLASSES_PAD = 128          # lane-dense head output, sliced back in the wrapper
LN_EPS = 1e-6
NOISE_LAYER_INDEX = 1          # block at which OptimalQ ("linear" noise, train=True) applies

GRID = IMG // PATCH
NUM_PATCHES = GRID * GRID
SEQ = NUM_PATCHES + 1          # +1 cls token
SEQP = 8                       # SEQ padded up to the 8-sublane granule
HEAD_DIM = EMBED // HEADS
PATCH_K = IN_CH * PATCH * PATCH          # 192 = im2col columns / Conv2d fan-in

# ---- packed "vecs" slab layout (rows x VEC_W lanes) -------------------------
VEC_W = max(MLP_HIDDEN, 3 * EMBED, NUM_CLASSES_PAD)      # 256
VEC_BLK_ROWS = 8                                         # rows per transformer block
VEC_FB = SEQP + DEPTH * VEC_BLK_ROWS                     # final norm_w / norm_b / head_b rows
VEC_HEADW = ((VEC_FB + 3 + 7) // 8) * 8                  # head weight rows (8-aligned)
VEC_ROWS = VEC_HEADW + EMBED

# TODO(synk): opt.OptimalQ is an external config flag; assumed True, so the 'linear'
# noise branch applies OptimalQ at NOISE_LAYER_INDEX (train=True path).
# TODO(synk): 'gaussian' / 'impulse' noise branches rely on torch RNG semantics and are
# not implemented (only the deterministic 'linear'/OptimalQ path is).
# TODO(synk): batch-parallel grid (v7x 2nd TensorCore) not used because OptimalQ couples
# samples across the batch at the noise block and B=2; grid=(1,) keeps one program.


# ------------------------------ kernel helpers -------------------------------
def _layernorm(x, w, b):
    mu = jnp.mean(x, axis=-1, keepdims=True)
    xc = x - mu
    var = jnp.mean(xc * xc, axis=-1, keepdims=True)
    return xc * jax.lax.rsqrt(var + LN_EPS) * w + b


def _gelu_exact(x):
    # nn.GELU default (exact, erf based).  Perf review suggested tanh-approx (EUP);
    # kept exact to preserve PyTorch forward semantics -- tensor is only (BP, 256).
    return 0.5 * x * (1.0 + jax.lax.erf(x * (1.0 / math.sqrt(2.0))))


def _zero_map(ndim):
    return lambda i: (0,) * ndim


# ------------------------------- fused kernel --------------------------------
def _fused_vit_kernel(patches_ref, w64_ref, w192_ref, w256_ref, vecs_ref, out_ref,
                      *, batch, noise_idx):
    bp = batch * SEQP
    scale = HEAD_DIM ** -0.5
    inv_bp1 = 1.0 / float(batch + 1)

    # ---- patch embedding (Conv2d as im2col matmul) + cls/pos/conv-bias addon ----
    x = jnp.dot(patches_ref[...], w64_ref[0:PATCH_K, :],
                preferred_element_type=jnp.float32)                       # (BP, D)
    addon = vecs_ref[0:SEQP, 0:EMBED]                                     # (SEQP, D)
    x = (x.reshape(batch, SEQP, EMBED) + addon[None, :, :]).reshape(bp, EMBED)

    # ---- invariant masks, built once (hoisted out of the block loop) ----
    key_ids = jax.lax.broadcasted_iota(jnp.int32, (1, SEQP, SEQP), 2)
    key_mask = jnp.where(key_ids < SEQ, 0.0, -1e30).astype(jnp.float32)   # mask pad keys
    tok_ids = jax.lax.broadcasted_iota(jnp.int32, (batch, SEQP, EMBED), 1)

    for blk in range(DEPTH):
        vb = SEQP + blk * VEC_BLK_ROWS                    # vecs rows for this block
        wb = PATCH_K + blk * (EMBED + MLP_HIDDEN)         # w64 rows: proj_w then mlp_w2
        qb = blk * EMBED                                  # w192 / w256 rows

        # ------------------------------ attention ------------------------------
        xn = _layernorm(x, vecs_ref[vb:vb + 1, 0:EMBED], vecs_ref[vb + 1:vb + 2, 0:EMBED])

        if blk == noise_idx:
            # OptimalQ ('linear' noise, train=True) on the norm1 output, pre-QKV.
            # PyTorch: x[:,1:] <- x - x*(B-1)/(B+1) + (sum_{b'!=b} x[b'])/(B+1)
            #   noise_b = sum_all - x_b  =>  x*(2/(B+1)) + (sum_all - x)/(B+1)
            #          == (x + sum_over_all_b x)/(B+1)   (current sample counted twice)
            # Padded token rows (ids 5..7) also receive the noise; harmless because
            # padded keys are masked below and every other op is per-token.
            x3 = xn.reshape(batch, SEQP, EMBED)
            tot = jnp.sum(x3, axis=0, keepdims=True)
            x3 = jnp.where(tok_ids == 0, x3, (x3 + tot) * inv_bp1)
            xn = x3.reshape(bp, EMBED)

        qkv = (jnp.dot(xn, w192_ref[qb:qb + EMBED, :], preferred_element_type=jnp.float32)
               + vecs_ref[vb + 2:vb + 3, 0:3 * EMBED])                    # (BP, 3D)

        # Head-batched attention: fold (head, batch) into ONE leading batch axis so a
        # single pair of 3-D einsums and ONE softmax cover all heads.
        def split_heads(col0):
            return jnp.concatenate(
                [qkv[:, col0 + h * HEAD_DIM: col0 + (h + 1) * HEAD_DIM]
                 .reshape(batch, SEQP, HEAD_DIM) for h in range(HEADS)], axis=0)

        q3 = split_heads(0)                                               # (H*B, S, hd)
        k3 = split_heads(EMBED)
        v3 = split_heads(2 * EMBED)

        s = jnp.einsum('bqd,bkd->bqk', q3, k3,
                       preferred_element_type=jnp.float32) * scale + key_mask
        s = s - jnp.max(s, axis=-1, keepdims=True)
        e = jnp.exp(s)
        p = e * pl.reciprocal(jnp.sum(e, axis=-1, keepdims=True), approx=True)
        o3 = jnp.einsum('bqk,bkd->bqd', p, v3,
                        preferred_element_type=jnp.float32)               # (H*B, S, hd)

        # Fold each head's output straight into the output projection.  Same total MXU
        # work as one (BP,64)@(64,64) matmul after a head concat, but avoids a
        # sub-128-lane minor-dim concatenate (risky Mosaic lowering at 16-lane offsets).
        proj_w = w64_ref[wb:wb + EMBED, :]                                # (D, D)
        attn_proj = None
        for h in range(HEADS):
            o_h = o3[h * batch:(h + 1) * batch].reshape(bp, HEAD_DIM)
            contrib = jnp.dot(o_h, proj_w[h * HEAD_DIM:(h + 1) * HEAD_DIM, :],
                              preferred_element_type=jnp.float32)
            attn_proj = contrib if attn_proj is None else attn_proj + contrib

        x = x + attn_proj + vecs_ref[vb + 3:vb + 4, 0:EMBED]              # residual 1

        # -------------------------------- MLP ----------------------------------
        xn2 = _layernorm(x, vecs_ref[vb + 4:vb + 5, 0:EMBED],
                         vecs_ref[vb + 5:vb + 6, 0:EMBED])
        h1 = (jnp.dot(xn2, w256_ref[qb:qb + EMBED, :], preferred_element_type=jnp.float32)
              + vecs_ref[vb + 6:vb + 7, 0:MLP_HIDDEN])
        h1 = _gelu_exact(h1)
        x = x + (jnp.dot(h1, w64_ref[wb + EMBED:wb + EMBED + MLP_HIDDEN, :],
                         preferred_element_type=jnp.float32)
                 + vecs_ref[vb + 7:vb + 8, 0:EMBED])                      # residual 2

    # ---- final LayerNorm (self.norm; fc_norm is Identity) + classifier head -----
    # LN/head are per-token; the wrapper keeps only the cls row afterwards.
    xf = _layernorm(x, vecs_ref[VEC_FB:VEC_FB + 1, 0:EMBED],
                    vecs_ref[VEC_FB + 1:VEC_FB + 2, 0:EMBED])
    out_ref[...] = (jnp.dot(xf, vecs_ref[VEC_HEADW:VEC_HEADW + EMBED, 0:NUM_CLASSES_PAD],
                            preferred_element_type=jnp.float32)
                    + vecs_ref[VEC_FB + 2:VEC_FB + 3, 0:NUM_CLASSES_PAD])


# ------------------------------ glue / wrapper --------------------------------
def extract_patches(x):
    # x: (B, C, H, W) NCHW -> (B, num_patches, C*ph*pw); ordering matches Conv2d
    # weight flattening (out, C, ph, pw) -> (out, C*ph*pw).
    B, C, H, W = x.shape
    gh, gw = H // PATCH, W // PATCH
    x = x.reshape(B, C, gh, PATCH, gw, PATCH)
    x = x.transpose(0, 2, 4, 1, 3, 5)               # (B, gh, gw, C, ph, pw)
    return x.reshape(B, gh * gw, C * PATCH * PATCH)


def _vec_row(v):
    v = jnp.asarray(v, jnp.float32).reshape(1, -1)
    return jnp.pad(v, ((0, 0), (0, VEC_W - v.shape[1])))


@functools.partial(jax.jit, static_argnames=('noise_layer_index',))
def noise_vit_forward(x_img, params, noise_layer_index=NOISE_LAYER_INDEX):
    B = x_img.shape[0]

    # --- activations: im2col + sequence padding (cls row + pad rows are zero patches,
    #     so the patch-embed matmul produces 0 there and 'addon' fills in).
    patches = extract_patches(x_img)                                   # (B, NP, K)
    patches_pad = jnp.zeros((B, SEQP, PATCH_K), jnp.float32)
    patches_pad = patches_pad.at[:, 1:1 + NUM_PATCHES, :].set(patches)
    patches_pad = patches_pad.reshape(B * SEQP, PATCH_K)

    # --- pack ALL parameters into 4 slabs (one DMA each) ---------------------------
    w64 = jnp.concatenate(
        [params['patch_w']]
        + [m for blk in params['blocks'] for m in (blk['proj_w'], blk['mlp_w2'])],
        axis=0)                                                        # (192+D*320, 64)
    w192 = jnp.concatenate([blk['qkv_w'] for blk in params['blocks']], axis=0)
    w256 = jnp.concatenate([blk['mlp_w1'] for blk in params['blocks']], axis=0)

    # row 0: cls + pos[0]; rows 1..NP: pos[i] + conv bias; pad rows: 0
    addon = jnp.zeros((SEQP, EMBED), jnp.float32)
    addon = addon.at[0].set(params['cls_token'].reshape(EMBED) + params['pos_embed'][0, 0])
    addon = addon.at[1:SEQ].set(params['pos_embed'][0, 1:SEQ]
                                + params['patch_b'].reshape(1, EMBED))

    # lane-dense head weights (pad 8 -> 128 output lanes; sliced back below)
    head_b_pad = jnp.zeros((1, NUM_CLASSES_PAD), jnp.float32)
    head_b_pad = head_b_pad.at[:, :NUM_CLASSES].set(params['head_b'])
    head_w_pad = jnp.zeros((EMBED, NUM_CLASSES_PAD), jnp.float32)
    head_w_pad = head_w_pad.at[:, :NUM_CLASSES].set(params['head_w'])

    rows = [jnp.pad(addon, ((0, 0), (0, VEC_W - EMBED)))]
    for blk in params['blocks']:
        rows += [_vec_row(blk[k]) for k in
                 ('ln1_w', 'ln1_b', 'qkv_b', 'proj_b', 'ln2_w', 'ln2_b', 'mlp_b1', 'mlp_b2')]
    rows += [_vec_row(params['norm_w']), _vec_row(params['norm_b']), _vec_row(head_b_pad)]
    rows += [jnp.zeros((VEC_HEADW - (VEC_FB + 3), VEC_W), jnp.float32)]
    rows += [jnp.pad(head_w_pad, ((0, 0), (0, VEC_W - NUM_CLASSES_PAD)))]
    vecs = jnp.concatenate(rows, axis=0)                               # (VEC_ROWS, VEC_W)

    args = [patches_pad, w64, w192, w256, vecs]
    kernel = functools.partial(_fused_vit_kernel, batch=B, noise_idx=noise_layer_index)

    out_shape = jax.ShapeDtypeStruct((B * SEQP, NUM_CLASSES_PAD), jnp.float32)
    out = pl.pallas_call(
        kernel,
        out_shape=out_shape,
        grid=(1,),
        in_specs=[pl.BlockSpec(a.shape, _zero_map(a.ndim)) for a in args],
        out_specs=pl.BlockSpec(out_shape.shape, _zero_map(2)),
        compiler_params=pltpu.CompilerParams(dimension_semantics=("arbitrary",)),
    )(*args)

    # keep only the cls-token row and the real class lanes
    return out.reshape(B, SEQP, NUM_CLASSES_PAD)[:, 0, :NUM_CLASSES]


# --------------------------- deterministic init --------------------------------
def init_params(key):
    keys = iter(jax.random.split(key, 4 + DEPTH * 4))

    def nrm(shape, std=0.02):
        return (std * jax.random.normal(next(keys), shape)).astype(jnp.float32)

    params = dict(
        patch_w=nrm((PATCH_K, EMBED)),                 # Conv2d weight, flattened+transposed
        patch_b=jnp.zeros((1, EMBED), jnp.float32),
        cls_token=nrm((1, 1, EMBED), 1e-6),
        pos_embed=nrm((1, SEQ, EMBED), 0.02),
        norm_w=jnp.ones((1, EMBED), jnp.float32),
        norm_b=jnp.zeros((1, EMBED), jnp.float32),
        head_w=nrm((EMBED, NUM_CLASSES)),
        head_b=jnp.zeros((1, NUM_CLASSES), jnp.float32),
        blocks=[],
    )
    for _ in range(DEPTH):
        bkeys = iter(jax.random.split(next(keys), 4))

        def bnrm(shape, std=0.02):
            return (std * jax.random.normal(next(bkeys), shape)).astype(jnp.float32)

        params['blocks'].append(dict(
            ln1_w=jnp.ones((1, EMBED), jnp.float32),
            ln1_b=jnp.zeros((1, EMBED), jnp.float32),
            qkv_w=bnrm((EMBED, 3 * EMBED)),            # (in, out) == W.T
            qkv_b=jnp.zeros((1, 3 * EMBED), jnp.float32),
            proj_w=bnrm((EMBED, EMBED)),
            proj_b=jnp.zeros((1, EMBED), jnp.float32),
            ln2_w=jnp.ones((1, EMBED), jnp.float32),
            ln2_b=jnp.zeros((1, EMBED), jnp.float32),
            mlp_w1=bnrm((EMBED, MLP_HIDDEN)),
            mlp_b1=jnp.zeros((1, MLP_HIDDEN), jnp.float32),
            mlp_w2=bnrm((MLP_HIDDEN, EMBED)),
            mlp_b2=jnp.zeros((1, EMBED), jnp.float32),
        ))
    return params


# ----------------------------------- main --------------------------------------
if __name__ == "__main__":
    key = jax.random.PRNGKey(0)
    pkey, xkey = jax.random.split(key)
    params = init_params(pkey)
    x = jax.random.normal(xkey, (2, IN_CH, IMG, IMG), dtype=jnp.float32)

    logits = noise_vit_forward(x, params)
    logits = jax.block_until_ready(logits)

    assert logits.shape == (2, NUM_CLASSES)
    assert bool(jnp.all(jnp.isfinite(logits)))
    print("KERNEL_OK")
</pallas_src>

<mosaic_0001>
module attributes {stable_mosaic.version = 11 : i64} {
  func.func @_fused_vit_kernel(%arg0: i32, %arg1: memref<16x192xf32, #tpu.memory_space<vmem>>, %arg2: memref<832x64xf32, #tpu.memory_space<vmem>>, %arg3: memref<128x192xf32, #tpu.memory_space<vmem>>, %arg4: memref<128x256xf32, #tpu.memory_space<vmem>>, %arg5: memref<96x256xf32, #tpu.memory_space<vmem>>, %arg6: memref<16x128xf32, #tpu.memory_space<vmem>>) attributes {dimension_semantics = [#tpu.dimension_semantics<arbitrary>], iteration_bounds = array<i64: 1>, scalar_prefetch = 0 : i64, scratch_operands = 0 : i64, tpu.core_type = #tpu.core_type<tc>, window_params = [{pipeline_mode = #tpu.pipeline_mode<synchronous>, transform_indices = @transform_0, window_bounds = array<i64: 16, 192>}, {pipeline_mode = #tpu.pipeline_mode<synchronous>, transform_indices = @transform_1, window_bounds = array<i64: 832, 64>}, {pipeline_mode = #tpu.pipeline_mode<synchronous>, transform_indices = @transform_2, window_bounds = array<i64: 128, 192>}, {pipeline_mode = #tpu.pipeline_mode<synchronous>, transform_indices = @transform_3, window_bounds = array<i64: 128, 256>}, {pipeline_mode = #tpu.pipeline_mode<synchronous>, transform_indices = @transform_4, window_bounds = array<i64: 96, 256>}, {pipeline_mode = #tpu.pipeline_mode<synchronous>, transform_indices = @transform_5, window_bounds = array<i64: 16, 128>}]} {
    %c0 = arith.constant 0 : index
    %c0_0 = arith.constant 0 : index
    %0 = vector.load %arg1[%c0, %c0_0] : memref<16x192xf32, #tpu.memory_space<vmem>>, vector<16x192xf32>
    %c0_1 = arith.constant 0 : index
    %c0_2 = arith.constant 0 : index
    %1 = vector.load %arg2[%c0_1, %c0_2] : memref<832x64xf32, #tpu.memory_space<vmem>>, vector<192x64xf32>
    %cst = arith.constant dense<0.000000e+00> : vector<16x64xf32>
    %2 = tpu.matmul %0, %1, %cst {dimension_numbers = #tpu.dot_dimension_numbers<[1], [0], [0], [1], [0, 0, 1, 1], [], []>} : vector<16x192xf32>, vector<192x64xf32>, vector<16x64xf32> -> vector<16x64xf32>
    %c0_3 = arith.constant 0 : index
    %c0_4 = arith.constant 0 : index
    %3 = vector.load %arg5[%c0_3, %c0_4] : memref<96x256xf32, #tpu.memory_space<vmem>>, vector<8x64xf32>
    %4 = vector.shape_cast %2 : vector<16x64xf32> to vector<2x8x64xf32>
    %5 = vector.shape_cast %3 : vector<8x64xf32> to vector<1x8x64xf32>
    %6 = vector.broadcast %5 : vector<1x8x64xf32> to vector<2x8x64xf32>
    %7 = arith.addf %4, %6 : vector<2x8x64xf32>
    %8 = vector.shape_cast %7 : vector<2x8x64xf32> to vector<16x64xf32>
    %9 = tpu.iota {dimensions = array<i32: 2>} : vector<1x8x8xi32>
    %c5_i32 = arith.constant 5 : i32
    %10 = vector.broadcast %c5_i32 : i32 to vector<1x8x8xi32>
    %11 = arith.cmpi slt, %9, %10 : vector<1x8x8xi32>
    %cst_5 = arith.constant 0.000000e+00 : f32
    %cst_6 = arith.constant -1.000000e+30 : f32
    %12 = vector.broadcast %cst_5 : f32 to vector<1x8x8xf32>
    %13 = vector.broadcast %cst_6 : f32 to vector<1x8x8xf32>
    %14 = arith.select %11, %12, %13 : vector<1x8x8xi1>, vector<1x8x8xf32>
    %15 = tpu.iota {dimensions = array<i32: 1>} : vector<2x8x64xi32>
    %c8 = arith.constant 8 : index
    %c0_7 = arith.constant 0 : index
    %16 = vector.load %arg5[%c8, %c0_7] : memref<96x256xf32, #tpu.memory_space<vmem>>, vector<1x64xf32>
    %c9 = arith.constant 9 : index
    %c0_8 = arith.constant 0 : index
    %17 = vector.load %arg5[%c9, %c0_8] : memref<96x256xf32, #tpu.memory_space<vmem>>, vector<1x64xf32>
    %cst_9 = arith.constant dense<0.000000e+00> : vector<16xf32>
    %18 = vector.multi_reduction <add>, %8, %cst_9 [1] : vector<16x64xf32> to vector<16xf32>
    %19 = vector.shape_cast %18 : vector<16xf32> to vector<16x1xf32>
    %cst_10 = arith.constant 6.400000e+01 : f32
    %20 = vector.broadcast %cst_10 : f32 to vector<16x1xf32>
    %21 = arith.divf %19, %20 : vector<16x1xf32>
    %22 = vector.broadcast %21 : vector<16x1xf32> to vector<16x64xf32>
    %23 = arith.subf %8, %22 : vector<16x64xf32>
    %24 = arith.mulf %23, %23 : vector<16x64xf32>
    %cst_11 = arith.constant dense<0.000000e+00> : vector<16xf32>
    %25 = vector.multi_reduction <add>, %24, %cst_11 [1] : vector<16x64xf32> to vector<16xf32>
    %26 = vector.shape_cast %25 : vector<16xf32> to vector<16x1xf32>
    %cst_12 = arith.constant 6.400000e+01 : f32
    %27 = vector.broadcast %cst_12 : f32 to vector<16x1xf32>
    %28 = arith.divf %26, %27 : vector<16x1xf32>
    %cst_13 = arith.constant 9.99999997E-7 : f32
    %29 = vector.broadcast %cst_13 : f32 to vector<16x1xf32>
    %30 = arith.addf %28, %29 : vector<16x1xf32>
    %31 = math.rsqrt %30 : vector<16x1xf32>
    %32 = vector.broadcast %31 : vector<16x1xf32> to vector<16x64xf32>
    %33 = arith.mulf %23, %32 : vector<16x64xf32>
    %34 = vector.broadcast %16 : vector<1x64xf32> to vector<16x64xf32>
    %35 = arith.mulf %33, %34 : vector<16x64xf32>
    %36 = vector.broadcast %17 : vector<1x64xf32> to vector<16x64xf32>
    %37 = arith.addf %35, %36 : vector<16x64xf32>
    %c0_14 = arith.constant 0 : index
    %c0_15 = arith.constant 0 : index
    %38 = vector.load %arg3[%c0_14, %c0_15] : memref<128x192xf32, #tpu.memory_space<vmem>>, vector<64x192xf32>
    %cst_16 = arith.constant dense<0.000000e+00> : vector<16x192xf32>
    %39 = tpu.matmul %37, %38, %cst_16 {dimension_numbers = #tpu.dot_dimension_numbers<[1], [0], [0], [1], [0, 0, 1, 1], [], []>} : vector<16x64xf32>, vector<64x192xf32>, vector<16x192xf32> -> vector<16x192xf32>
    %c10 = arith.constant 10 : index
    %c0_17 = arith.constant 0 : index
    %40 = vector.load %arg5[%c10, %c0_17] : memref<96x256xf32, #tpu.memory_space<vmem>>, vector<1x192xf32>
    %41 = vector.broadcast %40 : vector<1x192xf32> to vector<16x192xf32>
    %42 = arith.addf %39, %41 : vector<16x192xf32>
    %43 = vector.extract_strided_slice %42 {offsets = [0, 0], sizes = [16, 16], strides = [1, 1]} : vector<16x192xf32> to vector<16x16xf32>
    %44 = vector.shape_cast %43 : vector<16x16xf32> to vector<2x8x16xf32>
    %45 = vector.extract_strided_slice %42 {offsets = [0, 16], sizes = [16, 16], strides = [1, 1]} : vector<16x192xf32> to vector<16x16xf32>
    %46 = vector.shape_cast %45 : vector<16x16xf32> to vector<2x8x16xf32>
    %47 = vector.extract_strided_slice %42 {offsets = [0, 32], sizes = [16, 16], strides = [1, 1]} : vector<16x192xf32> to vector<16x16xf32>
    %48 = vector.shape_cast %47 : vector<16x16xf32> to vector<2x8x16xf32>
    %49 = vector.extract_strided_slice %42 {offsets = [0, 48], sizes = [16, 16], strides = [1, 1]} : vector<16x192xf32> to vector<16x16xf32>
    %50 = vector.shape_cast %49 : vector<16x16xf32> to vector<2x8x16xf32>
    %51 = tpu.concatenate %44, %46, %48, %50 in 0 : vector<2x8x16xf32>, vector<2x8x16xf32>, vector<2x8x16xf32>, vector<2x8x16xf32> -> vector<8x8x16xf32>
    %52 = vector.extract_strided_slice %42 {offsets = [0, 64], sizes = [16, 16], strides = [1, 1]} : vector<16x192xf32> to vector<16x16xf32>
    %53 = vector.shape_cast %52 : vector<16x16xf32> to vector<2x8x16xf32>
    %54 = vector.extract_strided_slice %42 {offsets = [0, 80], sizes = [16, 16], strides = [1, 1]} : vector<16x192xf32> to vector<16x16xf32>
    %55 = vector.shape_cast %54 : vector<16x16xf32> to vector<2x8x16xf32>
    %56 = vector.extract_strided_slice %42 {offsets = [0, 96], sizes = [16, 16], strides = [1, 1]} : vector<16x192xf32> to vector<16x16xf32>
    %57 = vector.shape_cast %56 : vector<16x16xf32> to vector<2x8x16xf32>
    %58 = vector.extract_strided_slice %42 {offsets = [0, 112], sizes = [16, 16], strides = [1, 1]} : vector<16x192xf32> to vector<16x16xf32>
    %59 = vector.shape_cast %58 : vector<16x16xf32> to vector<2x8x16xf32>
    %60 = tpu.concatenate %53, %55, %57, %59 in 0 : vector<2x8x16xf32>, vector<2x8x16xf32>, vector<2x8x16xf32>, vector<2x8x16xf32> -> vector<8x8x16xf32>
    %61 = vector.extract_strided_slice %42 {offsets = [0, 128], sizes = [16, 16], strides = [1, 1]} : vector<16x192xf32> to vector<16x16xf32>
    %62 = vector.shape_cast %61 : vector<16x16xf32> to vector<2x8x16xf32>
    %63 = vector.extract_strided_slice %42 {offsets = [0, 144], sizes = [16, 16], strides = [1, 1]} : vector<16x192xf32> to vector<16x16xf32>
    %64 = vector.shape_cast %63 : vector<16x16xf32> to vector<2x8x16xf32>
    %65 = vector.extract_strided_slice %42 {offsets = [0, 160], sizes = [16, 16], strides = [1, 1]} : vector<16x192xf32> to vector<16x16xf32>
    %66 = vector.shape_cast %65 : vector<16x16xf32> to vector<2x8x16xf32>
    %67 = vector.extract_strided_slice %42 {offsets = [0, 176], sizes = [16, 16], strides = [1, 1]} : vector<16x192xf32> to vector<16x16xf32>
    %68 = vector.shape_cast %67 : vector<16x16xf32> to vector<2x8x16xf32>
    %69 = tpu.concatenate %62, %64, %66, %68 in 0 : vector<2x8x16xf32>, vector<2x8x16xf32>, vector<2x8x16xf32>, vector<2x8x16xf32> -> vector<8x8x16xf32>
    "tpu.trace_start"() <{level = 10 : i32, message = "bqd,bkd->bqk"}> : () -> ()
    %cst_18 = arith.constant dense<0.000000e+00> : vector<8x8x8xf32>
    %70 = tpu.matmul %51, %60, %cst_18 {dimension_numbers = #tpu.dot_dimension_numbers<[2], [2], [1], [1], [0, 0, 0, 1, 1, 1], [0], [0]>} : vector<8x8x16xf32>, vector<8x8x16xf32>, vector<8x8x8xf32> -> vector<8x8x8xf32>
    "tpu.trace_stop"() : () -> ()
    %cst_19 = arith.constant 2.500000e-01 : f32
    %71 = vector.broadcast %cst_19 : f32 to vector<8x8x8xf32>
    %72 = arith.mulf %70, %71 : vector<8x8x8xf32>
    %73 = vector.broadcast %14 : vector<1x8x8xf32> to vector<8x8x8xf32>
    %74 = arith.addf %72, %73 : vector<8x8x8xf32>
    %cst_20 = arith.constant dense<0xFF800000> : vector<8x8xf32>
    %75 = vector.multi_reduction <maximumf>, %74, %cst_20 [2] : vector<8x8x8xf32> to vector<8x8xf32>
    %76 = vector.shape_cast %75 : vector<8x8xf32> to vector<8x8x1xf32>
    %77 = vector.broadcast %76 : vector<8x8x1xf32> to vector<8x8x8xf32>
    %78 = arith.subf %74, %77 : vector<8x8x8xf32>
    %79 = math.exp %78 : vector<8x8x8xf32>
    %cst_21 = arith.constant dense<0.000000e+00> : vector<8x8xf32>
    %80 = vector.multi_reduction <add>, %79, %cst_21 [2] : vector<8x8x8xf32> to vector<8x8xf32>
    %81 = vector.shape_cast %80 : vector<8x8xf32> to vector<8x8x1xf32>
    %82 = tpu.reciprocal %81 {approx = true} : vector<8x8x1xf32> -> vector<8x8x1xf32>
    %83 = vector.broadcast %82 : vector<8x8x1xf32> to vector<8x8x8xf32>
    %84 = arith.mulf %79, %83 : vector<8x8x8xf32>
    "tpu.trace_start"() <{level = 10 : i32, message = "bqk,bkd->bqd"}> : () -> ()
    %cst_22 = arith.constant dense<0.000000e+00> : vector<8x8x16xf32>
    %85 = tpu.matmul %84, %69, %cst_22 {dimension_numbers = #tpu.dot_dimension_numbers<[2], [1], [1], [2], [0, 0, 0, 1, 1, 2], [0], [0]>} : vector<8x8x8xf32>, vector<8x8x16xf32>, vector<8x8x16xf32> -> vector<8x8x16xf32>
    "tpu.trace_stop"() : () -> ()
    %c192 = arith.constant 192 : index
    %c0_23 = arith.constant 0 : index
    %86 = vector.load %arg2[%c192, %c0_23] : memref<832x64xf32, #tpu.memory_space<vmem>>, vector<64x64xf32>
    %87 = vector.extract_strided_slice %85 {offsets = [0, 0, 0], sizes = [2, 8, 16], strides = [1, 1, 1]} : vector<8x8x16xf32> to vector<2x8x16xf32>
    %88 = vector.shape_cast %87 : vector<2x8x16xf32> to vector<16x16xf32>
    %89 = vector.extract_strided_slice %86 {offsets = [0, 0], sizes = [16, 64], strides = [1, 1]} : vector<64x64xf32> to vector<16x64xf32>
    %cst_24 = arith.constant dense<0.000000e+00> : vector<16x64xf32>
    %90 = tpu.matmul %88, %89, %cst_24 {dimension_numbers = #tpu.dot_dimension_numbers<[1], [0], [0], [1], [0, 0, 1, 1], [], []>} : vector<16x16xf32>, vector<16x64xf32>, vector<16x64xf32> -> vector<16x64xf32>
    %91 = vector.extract_strided_slice %85 {offsets = [2, 0, 0], sizes = [2, 8, 16], strides = [1, 1, 1]} : vector<8x8x16xf32> to vector<2x8x16xf32>
    %92 = vector.shape_cast %91 : vector<2x8x16xf32> to vector<16x16xf32>
    %93 = vector.extract_strided_slice %86 {offsets = [16, 0], sizes = [16, 64], strides = [1, 1]} : vector<64x64xf32> to vector<16x64xf32>
    %cst_25 = arith.constant dense<0.000000e+00> : vector<16x64xf32>
    %94 = tpu.matmul %92, %93, %cst_25 {dimension_numbers = #tpu.dot_dimension_numbers<[1], [0], [0], [1], [0, 0, 1, 1], [], []>} : vector<16x16xf32>, vector<16x64xf32>, vector<16x64xf32> -> vector<16x64xf32>
    %95 = arith.addf %90, %94 : vector<16x64xf32>
    %96 = vector.extract_strided_slice %85 {offsets = [4, 0, 0], sizes = [2, 8, 16], strides = [1, 1, 1]} : vector<8x8x16xf32> to vector<2x8x16xf32>
    %97 = vector.shape_cast %96 : vector<2x8x16xf32> to vector<16x16xf32>
    %98 = vector.extract_strided_slice %86 {offsets = [32, 0], sizes = [16, 64], strides = [1, 1]} : vector<64x64xf32> to vector<16x64xf32>
    %cst_26 = arith.constant dense<0.000000e+00> : vector<16x64xf32>
    %99 = tpu.matmul %97, %98, %cst_26 {dimension_numbers = #tpu.dot_dimension_numbers<[1], [0], [0], [1], [0, 0, 1, 1], [], []>} : vector<16x16xf32>, vector<16x64xf32>, vector<16x64xf32> -> vector<16x64xf32>
    %100 = arith.addf %95, %99 : vector<16x64xf32>
    %101 = vector.extract_strided_slice %85 {offsets = [6, 0, 0], sizes = [2, 8, 16], strides = [1, 1, 1]} : vector<8x8x16xf32> to vector<2x8x16xf32>
    %102 = vector.shape_cast %101 : vector<2x8x16xf32> to vector<16x16xf32>
    %103 = vector.extract_strided_slice %86 {offsets = [48, 0], sizes = [16, 64], strides = [1, 1]} : vector<64x64xf32> to vector<16x64xf32>
    %cst_27 = arith.constant dense<0.000000e+00> : vector<16x64xf32>
    %104 = tpu.matmul %102, %103, %cst_27 {dimension_numbers = #tpu.dot_dimension_numbers<[1], [0], [0], [1], [0, 0, 1, 1], [], []>} : vector<16x16xf32>, vector<16x64xf32>, vector<16x64xf32> -> vector<16x64xf32>
    %105 = arith.addf %100, %104 : vector<16x64xf32>
    %106 = arith.addf %8, %105 : vector<16x64xf32>
    %c11 = arith.constant 11 : index
    %c0_28 = arith.constant 0 : index
    %107 = vector.load %arg5[%c11, %c0_28] : memref<96x256xf32, #tpu.memory_space<vmem>>, vector<1x64xf32>
    %108 = vector.broadcast %107 : vector<1x64xf32> to vector<16x64xf32>
    %109 = arith.addf %106, %108 : vector<16x64xf32>
    %c12 = arith.constant 12 : index
    %c0_29 = arith.constant 0 : index
    %110 = vector.load %arg5[%c12, %c0_29] : memref<96x256xf32, #tpu.memory_space<vmem>>, vector<1x64xf32>
    %c13 = arith.constant 13 : index
    %c0_30 = arith.constant 0 : index
    %111 = vector.load %arg5[%c13, %c0_30] : memref<96x256xf32, #tpu.memory_space<vmem>>, vector<1x64xf32>
    %cst_31 = arith.constant dense<0.000000e+00> : vector<16xf32>
    %112 = vector.multi_reduction <add>, %109, %cst_31 [1] : vector<16x64xf32> to vector<16xf32>
    %113 = vector.shape_cast %112 : vector<16xf32> to vector<16x1xf32>
    %cst_32 = arith.constant 6.400000e+01 : f32
    %114 = vector.broadcast %cst_32 : f32 to vector<16x1xf32>
    %115 = arith.divf %113, %114 : vector<16x1xf32>
    %116 = vector.broadcast %115 : vector<16x1xf32> to vector<16x64xf32>
    %117 = arith.subf %109, %116 : vector<16x64xf32>
    %118 = arith.mulf %117, %117 : vector<16x64xf32>
    %cst_33 = arith.constant dense<0.000000e+00> : vector<16xf32>
    %119 = vector.multi_reduction <add>, %118, %cst_33 [1] : vector<16x64xf32> to vector<16xf32>
    %120 = vector.shape_cast %119 : vector<16xf32> to vector<16x1xf32>
    %cst_34 = arith.constant 6.400000e+01 : f32
    %121 = vector.broadcast %cst_34 : f32 to vector<16x1xf32>
    %122 = arith.divf %120, %121 : vector<16x1xf32>
    %cst_35 = arith.constant 9.99999997E-7 : f32
    %123 = vector.broadcast %cst_35 : f32 to vector<16x1xf32>
    %124 = arith.addf %122, %123 : vector<16x1xf32>
    %125 = math.rsqrt %124 : vector<16x1xf32>
    %126 = vector.broadcast %125 : vector<16x1xf32> to vector<16x64xf32>
    %127 = arith.mulf %117, %126 : vector<16x64xf32>
    %128 = vector.broadcast %110 : vector<1x64xf32> to vector<16x64xf32>
    %129 = arith.mulf %127, %128 : vector<16x64xf32>
    %130 = vector.broadcast %111 : vector<1x64xf32> to vector<16x64xf32>
    %131 = arith.addf %129, %130 : vector<16x64xf32>
    %c0_36 = arith.constant 0 : index
    %c0_37 = arith.constant 0 : index
    %132 = vector.load %arg4[%c0_36, %c0_37] : memref<128x256xf32, #tpu.memory_space<vmem>>, vector<64x256xf32>
    %cst_38 = arith.constant dense<0.000000e+00> : vector<16x256xf32>
    %133 = tpu.matmul %131, %132, %cst_38 {dimension_numbers = #tpu.dot_dimension_numbers<[1], [0], [0], [1], [0, 0, 1, 1], [], []>} : vector<16x64xf32>, vector<64x256xf32>, vector<16x256xf32> -> vector<16x256xf32>
    %c14 = arith.constant 14 : index
    %c0_39 = arith.constant 0 : index
    %134 = vector.load %arg5[%c14, %c0_39] : memref<96x256xf32, #tpu.memory_space<vmem>>, vector<1x256xf32>
    %135 = vector.broadcast %134 : vector<1x256xf32> to vector<16x256xf32>
    %136 = arith.addf %133, %135 : vector<16x256xf32>
    %cst_40 = arith.constant 5.000000e-01 : f32
    %137 = vector.broadcast %cst_40 : f32 to vector<16x256xf32>
    %138 = arith.mulf %137, %136 : vector<16x256xf32>
    %cst_41 = arith.constant 0.707106769 : f32
    %139 = vector.broadcast %cst_41 : f32 to vector<16x256xf32>
    %140 = arith.mulf %136, %139 : vector<16x256xf32>
    %141 = math.erf %140 : vector<16x256xf32>
    %cst_42 = arith.constant 1.000000e+00 : f32
    %142 = vector.broadcast %cst_42 : f32 to vector<16x256xf32>
    %143 = arith.addf %142, %141 : vector<16x256xf32>
    %144 = arith.mulf %138, %143 : vector<16x256xf32>
    %c256 = arith.constant 256 : index
    %c0_43 = arith.constant 0 : index
    %145 = vector.load %arg2[%c256, %c0_43] : memref<832x64xf32, #tpu.memory_space<vmem>>, vector<256x64xf32>
    %cst_44 = arith.constant dense<0.000000e+00> : vector<16x64xf32>
    %146 = tpu.matmul %144, %145, %cst_44 {dimension_numbers = #tpu.dot_dimension_numbers<[1], [0], [0], [1], [0, 0, 1, 1], [], []>} : vector<16x256xf32>, vector<256x64xf32>, vector<16x64xf32> -> vector<16x64xf32>
    %c15 = arith.constant 15 : index
    %c0_45 = arith.constant 0 : index
    %147 = vector.load %arg5[%c15, %c0_45] : memref<96x256xf32, #tpu.memory_space<vmem>>, vector<1x64xf32>
    %148 = vector.broadcast %147 : vector<1x64xf32> to vector<16x64xf32>
    %149 = arith.addf %146, %148 : vector<16x64xf32>
    %150 = arith.addf %109, %149 : vector<16x64xf32>
    %c16 = arith.constant 16 : index
    %c0_46 = arith.constant 0 : index
    %151 = vector.load %arg5[%c16, %c0_46] : memref<96x256xf32, #tpu.memory_space<vmem>>, vector<1x64xf32>
    %c17 = arith.constant 17 : index
    %c0_47 = arith.constant 0 : index
    %152 = vector.load %arg5[%c17, %c0_47] : memref<96x256xf32, #tpu.memory_space<vmem>>, vector<1x64xf32>
    %cst_48 = arith.constant dense<0.000000e+00> : vector<16xf32>
    %153 = vector.multi_reduction <add>, %150, %cst_48 [1] : vector<16x64xf32> to vector<16xf32>
    %154 = vector.shape_cast %153 : vector<16xf32> to vector<16x1xf32>
    %cst_49 = arith.constant 6.400000e+01 : f32
    %155 = vector.broadcast %cst_49 : f32 to vector<16x1xf32>
    %156 = arith.divf %154, %155 : vector<16x1xf32>
    %157 = vector.broadcast %156 : vector<16x1xf32> to vector<16x64xf32>
    %158 = arith.subf %150, %157 : vector<16x64xf32>
    %159 = arith.mulf %158, %158 : vector<16x64xf32>
    %cst_50 = arith.constant dense<0.000000e+00> : vector<16xf32>
    %160 = vector.multi_reduction <add>, %159, %cst_50 [1] : vector<16x64xf32> to vector<16xf32>
    %161 = vector.shape_cast %160 : vector<16xf32> to vector<16x1xf32>
    %cst_51 = arith.constant 6.400000e+01 : f32
    %162 = vector.broadcast %cst_51 : f32 to vector<16x1xf32>
    %163 = arith.divf %161, %162 : vector<16x1xf32>
    %cst_52 = arith.constant 9.99999997E-7 : f32
    %164 = vector.broadcast %cst_52 : f32 to vector<16x1xf32>
    %165 = arith.addf %163, %164 : vector<16x1xf32>
    %166 = math.rsqrt %165 : vector<16x1xf32>
    %167 = vector.broadcast %166 : vector<16x1xf32> to vector<16x64xf32>
    %168 = arith.mulf %158, %167 : vector<16x64xf32>
    %169 = vector.broadcast %151 : vector<1x64xf32> to vector<16x64xf32>
    %170 = arith.mulf %168, %169 : vector<16x64xf32>
    %171 = vector.broadcast %152 : vector<1x64xf32> to vector<16x64xf32>
    %172 = arith.addf %170, %171 : vector<16x64xf32>
    %173 = vector.shape_cast %172 : vector<16x64xf32> to vector<2x8x64xf32>
    %cst_53 = arith.constant dense<0.000000e+00> : vector<8x64xf32>
    %174 = vector.multi_reduction <add>, %173, %cst_53 [0] : vector<2x8x64xf32> to vector<8x64xf32>
    %175 = vector.shape_cast %174 : vector<8x64xf32> to vector<1x8x64xf32>
    %c0_i32 = arith.constant 0 : i32
    %176 = vector.broadcast %c0_i32 : i32 to vector<2x8x64xi32>
    %177 = arith.cmpi eq, %15, %176 : vector<2x8x64xi32>
    %178 = vector.broadcast %175 : vector<1x8x64xf32> to vector<2x8x64xf32>
    %179 = arith.addf %173, %178 : vector<2x8x64xf32>
    %cst_54 = arith.constant 0.333333343 : f32
    %180 = vector.broadcast %cst_54 : f32 to vector<2x8x64xf32>
    %181 = arith.mulf %179, %180 : vector<2x8x64xf32>
    %182 = arith.select %177, %173, %181 : vector<2x8x64xi1>, vector<2x8x64xf32>
    %183 = vector.shape_cast %182 : vector<2x8x64xf32> to vector<16x64xf32>
    %c64 = arith.constant 64 : index
    %c0_55 = arith.constant 0 : index
    %184 = vector.load %arg3[%c64, %c0_55] : memref<128x192xf32, #tpu.memory_space<vmem>>, vector<64x192xf32>
    %cst_56 = arith.constant dense<0.000000e+00> : vector<16x192xf32>
    %185 = tpu.matmul %183, %184, %cst_56 {dimension_numbers = #tpu.dot_dimension_numbers<[1], [0], [0], [1], [0, 0, 1, 1], [], []>} : vector<16x64xf32>, vector<64x192xf32>, vector<16x192xf32> -> vector<16x192xf32>
    %c18 = arith.constant 18 : index
    %c0_57 = arith.constant 0 : index
    %186 = vector.load %arg5[%c18, %c0_57] : memref<96x256xf32, #tpu.memory_space<vmem>>, vector<1x192xf32>
    %187 = vector.broadcast %186 : vector<1x192xf32> to vector<16x192xf32>
    %188 = arith.addf %185, %187 : vector<16x192xf32>
    %189 = vector.extract_strided_slice %188 {offsets = [0, 0], sizes = [16, 16], strides = [1, 1]} : vector<16x192xf32> to vector<16x16xf32>
    %190 = vector.shape_cast %189 : vector<16x16xf32> to vector<2x8x16xf32>
    %191 = vector.extract_strided_slice %188 {offsets = [0, 16], sizes = [16, 16], strides = [1, 1]} : vector<16x192xf32> to vector<16x16xf32>
    %192 = vector.shape_cast %191 : vector<16x16xf32> to vector<2x8x16xf32>
    %193 = vector.extract_strided_slice %188 {offsets = [0, 32], sizes = [16, 16], strides = [1, 1]} : vector<16x192xf32> to vector<16x16xf32>
    %194 = vector.shape_cast %193 : vector<16x16xf32> to vector<2x8x16xf32>
    %195 = vector.extract_strided_slice %188 {offsets = [0, 48], sizes = [16, 16], strides = [1, 1]} : vector<16x192xf32> to vector<16x16xf32>
    %196 = vector.shape_cast %195 : vector<16x16xf32> to vector<2x8x16xf32>
    %197 = tpu.concatenate %190, %192, %194, %196 in 0 : vector<2x8x16xf32>, vector<2x8x16xf32>, vector<2x8x16xf32>, vector<2x8x16xf32> -> vector<8x8x16xf32>
    %198 = vector.extract_strided_slice %188 {offsets = [0, 64], sizes = [16, 16], strides = [1, 1]} : vector<16x192xf32> to vector<16x16xf32>
    %199 = vector.shape_cast %198 : vector<16x16xf32> to vector<2x8x16xf32>
    %200 = vector.extract_strided_slice %188 {offsets = [0, 80], sizes = [16, 16], strides = [1, 1]} : vector<16x192xf32> to vector<16x16xf32>
    %201 = vector.shape_cast %200 : vector<16x16xf32> to vector<2x8x16xf32>
    %202 = vector.extract_strided_slice %188 {offsets = [0, 96], sizes = [16, 16], strides = [1, 1]} : vector<16x192xf32> to vector<16x16xf32>
    %203 = vector.shape_cast %202 : vector<16x16xf32> to vector<2x8x16xf32>
    %204 = vector.extract_strided_slice %188 {offsets = [0, 112], sizes = [16, 16], strides = [1, 1]} : vector<16x192xf32> to vector<16x16xf32>
    %205 = vector.shape_cast %204 : vector<16x16xf32> to vector<2x8x16xf32>
    %206 = tpu.concatenate %199, %201, %203, %205 in 0 : vector<2x8x16xf32>, vector<2x8x16xf32>, vector<2x8x16xf32>, vector<2x8x16xf32> -> vector<8x8x16xf32>
    %207 = vector.extract_strided_slice %188 {offsets = [0, 128], sizes = [16, 16], strides = [1, 1]} : vector<16x192xf32> to vector<16x16xf32>
    %208 = vector.shape_cast %207 : vector<16x16xf32> to vector<2x8x16xf32>
    %209 = vector.extract_strided_slice %188 {offsets = [0, 144], sizes = [16, 16], strides = [1, 1]} : vector<16x192xf32> to vector<16x16xf32>
    %210 = vector.shape_cast %209 : vector<16x16xf32> to vector<2x8x16xf32>
    %211 = vector.extract_strided_slice %188 {offsets = [0, 160], sizes = [16, 16], strides = [1, 1]} : vector<16x192xf32> to vector<16x16xf32>
    %212 = vector.shape_cast %211 : vector<16x16xf32> to vector<2x8x16xf32>
    %213 = vector.extract_strided_slice %188 {offsets = [0, 176], sizes = [16, 16], strides = [1, 1]} : vector<16x192xf32> to vector<16x16xf32>
    %214 = vector.shape_cast %213 : vector<16x16xf32> to vector<2x8x16xf32>
    %215 = tpu.concatenate %208, %210, %212, %214 in 0 : vector<2x8x16xf32>, vector<2x8x16xf32>, vector<2x8x16xf32>, vector<2x8x16xf32> -> vector<8x8x16xf32>
    "tpu.trace_start"() <{level = 10 : i32, message = "bqd,bkd->bqk"}> : () -> ()
    %cst_58 = arith.constant dense<0.000000e+00> : vector<8x8x8xf32>
    %216 = tpu.matmul %197, %206, %cst_58 {dimension_numbers = #tpu.dot_dimension_numbers<[2], [2], [1], [1], [0, 0, 0, 1, 1, 1], [0], [0]>} : vector<8x8x16xf32>, vector<8x8x16xf32>, vector<8x8x8xf32> -> vector<8x8x8xf32>
    "tpu.trace_stop"() : () -> ()
    %cst_59 = arith.constant 2.500000e-01 : f32
    %217 = vector.broadcast %cst_59 : f32 to vector<8x8x8xf32>
    %218 = arith.mulf %216, %217 : vector<8x8x8xf32>
    %219 = vector.broadcast %14 : vector<1x8x8xf32> to vector<8x8x8xf32>
    %220 = arith.addf %218, %219 : vector<8x8x8xf32>
    %cst_60 = arith.constant dense<0xFF800000> : vector<8x8xf32>
    %221 = vector.multi_reduction <maximumf>, %220, %cst_60 [2] : vector<8x8x8xf32> to vector<8x8xf32>
    %222 = vector.shape_cast %221 : vector<8x8xf32> to vector<8x8x1xf32>
    %223 = vector.broadcast %222 : vector<8x8x1xf32> to vector<8x8x8xf32>
    %224 = arith.subf %220, %223 : vector<8x8x8xf32>
    %225 = math.exp %224 : vector<8x8x8xf32>
    %cst_61 = arith.constant dense<0.000000e+00> : vector<8x8xf32>
    %226 = vector.multi_reduction <add>, %225, %cst_61 [2] : vector<8x8x8xf32> to vector<8x8xf32>
    %227 = vector.shape_cast %226 : vector<8x8xf32> to vector<8x8x1xf32>
    %228 = tpu.reciprocal %227 {approx = true} : vector<8x8x1xf32> -> vector<8x8x1xf32>
    %229 = vector.broadcast %228 : vector<8x8x1xf32> to vector<8x8x8xf32>
    %230 = arith.mulf %225, %229 : vector<8x8x8xf32>
    "tpu.trace_start"() <{level = 10 : i32, message = "bqk,bkd->bqd"}> : () -> ()
    %cst_62 = arith.constant dense<0.000000e+00> : vector<8x8x16xf32>
    %231 = tpu.matmul %230, %215, %cst_62 {dimension_numbers = #tpu.dot_dimension_numbers<[2], [1], [1], [2], [0, 0, 0, 1, 1, 2], [0], [0]>} : vector<8x8x8xf32>, vector<8x8x16xf32>, vector<8x8x16xf32> -> vector<8x8x16xf32>
    "tpu.trace_stop"() : () -> ()
    %c512 = arith.constant 512 : index
    %c0_63 = arith.constant 0 : index
    %232 = vector.load %arg2[%c512, %c0_63] : memref<832x64xf32, #tpu.memory_space<vmem>>, vector<64x64xf32>
    %233 = vector.extract_strided_slice %231 {offsets = [0, 0, 0], sizes = [2, 8, 16], strides = [1, 1, 1]} : vector<8x8x16xf32> to vector<2x8x16xf32>
    %234 = vector.shape_cast %233 : vector<2x8x16xf32> to vector<16x16xf32>
    %235 = vector.extract_strided_slice %232 {offsets = [0, 0], sizes = [16, 64], strides = [1, 1]} : vector<64x64xf32> to vector<16x64xf32>
    %cst_64 = arith.constant dense<0.000000e+00> : vector<16x64xf32>
    %236 = tpu.matmul %234, %235, %cst_64 {dimension_numbers = #tpu.dot_dimension_numbers<[1], [0], [0], [1], [0, 0, 1, 1], [], []>} : vector<16x16xf32>, vector<16x64xf32>, vector<16x64xf32> -> vector<16x64xf32>
    %237 = vector.extract_strided_slice %231 {offsets = [2, 0, 0], sizes = [2, 8, 16], strides = [1, 1, 1]} : vector<8x8x16xf32> to vector<2x8x16xf32>
    %238 = vector.shape_cast %237 : vector<2x8x16xf32> to vector<16x16xf32>
    %239 = vector.extract_strided_slice %232 {offsets = [16, 0], sizes = [16, 64], strides = [1, 1]} : vector<64x64xf32> to vector<16x64xf32>
    %cst_65 = arith.constant dense<0.000000e+00> : vector<16x64xf32>
    %240 = tpu.matmul %238, %239, %cst_65 {dimension_numbers = #tpu.dot_dimension_numbers<[1], [0], [0], [1], [0, 0, 1, 1], [], []>} : vector<16x16xf32>, vector<16x64xf32>, vector<16x64xf32> -> vector<16x64xf32>
    %241 = arith.addf %236, %240 : vector<16x64xf32>
    %242 = vector.extract_strided_slice %231 {offsets = [4, 0, 0], sizes = [2, 8, 16], strides = [1, 1, 1]} : vector<8x8x16xf32> to vector<2x8x16xf32>
    %243 = vector.shape_cast %242 : vector<2x8x16xf32> to vector<16x16xf32>
    %244 = vector.extract_strided_slice %232 {offsets = [32, 0], sizes = [16, 64], strides = [1, 1]} : vector<64x64xf32> to vector<16x64xf32>
    %cst_66 = arith.constant dense<0.000000e+00> : vector<16x64xf32>
    %245 = tpu.matmul %243, %244, %cst_66 {dimension_numbers = #tpu.dot_dimension_numbers<[1], [0], [0], [1], [0, 0, 1, 1], [], []>} : vector<16x16xf32>, vector<16x64xf32>, vector<16x64xf32> -> vector<16x64xf32>
    %246 = arith.addf %241, %245 : vector<16x64xf32>
    %247 = vector.extract_strided_slice %231 {offsets = [6, 0, 0], sizes = [2, 8, 16], strides = [1, 1, 1]} : vector<8x8x16xf32> to vector<2x8x16xf32>
    %248 = vector.shape_cast %247 : vector<2x8x16xf32> to vector<16x16xf32>
    %249 = vector.extract_strided_slice %232 {offsets = [48, 0], sizes = [16, 64], strides = [1, 1]} : vector<64x64xf32> to vector<16x64xf32>
    %cst_67 = arith.constant dense<0.000000e+00> : vector<16x64xf32>
    %250 = tpu.matmul %248, %249, %cst_67 {dimension_numbers = #tpu.dot_dimension_numbers<[1], [0], [0], [1], [0, 0, 1, 1], [], []>} : vector<16x16xf32>, vector<16x64xf32>, vector<16x64xf32> -> vector<16x64xf32>
    %251 = arith.addf %246, %250 : vector<16x64xf32>
    %252 = arith.addf %150, %251 : vector<16x64xf32>
    %c19 = arith.constant 19 : index
    %c0_68 = arith.constant 0 : index
    %253 = vector.load %arg5[%c19, %c0_68] : memref<96x256xf32, #tpu.memory_space<vmem>>, vector<1x64xf32>
    %254 = vector.broadcast %253 : vector<1x64xf32> to vector<16x64xf32>
    %255 = arith.addf %252, %254 : vector<16x64xf32>
    %c20 = arith.constant 20 : index
    %c0_69 = arith.constant 0 : index
    %256 = vector.load %arg5[%c20, %c0_69] : memref<96x256xf32, #tpu.memory_space<vmem>>, vector<1x64xf32>
    %c21 = arith.constant 21 : index
    %c0_70 = arith.constant 0 : index
    %257 = vector.load %arg5[%c21, %c0_70] : memref<96x256xf32, #tpu.memory_space<vmem>>, vector<1x64xf32>
    %cst_71 = arith.constant dense<0.000000e+00> : vector<16xf32>
    %258 = vector.multi_reduction <add>, %255, %cst_71 [1] : vector<16x64xf32> to vector<16xf32>
    %259 = vector.shape_cast %258 : vector<16xf32> to vector<16x1xf32>
    %cst_72 = arith.constant 6.400000e+01 : f32
    %260 = vector.broadcast %cst_72 : f32 to vector<16x1xf32>
    %261 = arith.divf %259, %260 : vector<16x1xf32>
    %262 = vector.broadcast %261 : vector<16x1xf32> to vector<16x64xf32>
    %263 = arith.subf %255, %262 : vector<16x64xf32>
    %264 = arith.mulf %263, %263 : vector<16x64xf32>
    %cst_73 = arith.constant dense<0.000000e+00> : vector<16xf32>
    %265 = vector.multi_reduction <add>, %264, %cst_73 [1] : vector<16x64xf32> to vector<16xf32>
    %266 = vector.shape_cast %265 : vector<16xf32> to vector<16x1xf32>
    %cst_74 = arith.constant 6.400000e+01 : f32
    %267 = vector.broadcast %cst_74 : f32 to vector<16x1xf32>
    %268 = arith.divf %266, %267 : vector<16x1xf32>
    %cst_75 = arith.constant 9.99999997E-7 : f32
    %269 = vector.broadcast %cst_75 : f32 to vector<16x1xf32>
    %270 = arith.addf %268, %269 : vector<16x1xf32>
    %271 = math.rsqrt %270 : vector<16x1xf32>
    %272 = vector.broadcast %271 : vector<16x1xf32> to vector<16x64xf32>
    %273 = arith.mulf %263, %272 : vector<16x64xf32>
    %274 = vector.broadcast %256 : vector<1x64xf32> to vector<16x64xf32>
    %275 = arith.mulf %273, %274 : vector<16x64xf32>
    %276 = vector.broadcast %257 : vector<1x64xf32> to vector<16x64xf32>
    %277 = arith.addf %275, %276 : vector<16x64xf32>
    %c64_76 = arith.constant 64 : index
    %c0_77 = arith.constant 0 : index
    %278 = vector.load %arg4[%c64_76, %c0_77] : memref<128x256xf32, #tpu.memory_space<vmem>>, vector<64x256xf32>
    %cst_78 = arith.constant dense<0.000000e+00> : vector<16x256xf32>
    %279 = tpu.matmul %277, %278, %cst_78 {dimension_numbers = #tpu.dot_dimension_numbers<[1], [0], [0], [1], [0, 0, 1, 1], [], []>} : vector<16x64xf32>, vector<64x256xf32>, vector<16x256xf32> -> vector<16x256xf32>
    %c22 = arith.constant 22 : index
    %c0_79 = arith.constant 0 : index
    %280 = vector.load %arg5[%c22, %c0_79] : memref<96x256xf32, #tpu.memory_space<vmem>>, vector<1x256xf32>
    %281 = vector.broadcast %280 : vector<1x256xf32> to vector<16x256xf32>
    %282 = arith.addf %279, %281 : vector<16x256xf32>
    %cst_80 = arith.constant 5.000000e-01 : f32
    %283 = vector.broadcast %cst_80 : f32 to vector<16x256xf32>
    %284 = arith.mulf %283, %282 : vector<16x256xf32>
    %cst_81 = arith.constant 0.707106769 : f32
    %285 = vector.broadcast %cst_81 : f32 to vector<16x256xf32>
    %286 = arith.mulf %282, %285 : vector<16x256xf32>
    %287 = math.erf %286 : vector<16x256xf32>
    %cst_82 = arith.constant 1.000000e+00 : f32
    %288 = vector.broadcast %cst_82 : f32 to vector<16x256xf32>
    %289 = arith.addf %288, %287 : vector<16x256xf32>
    %290 = arith.mulf %284, %289 : vector<16x256xf32>
    %c576 = arith.constant 576 : index
    %c0_83 = arith.constant 0 : index
    %291 = vector.load %arg2[%c576, %c0_83] : memref<832x64xf32, #tpu.memory_space<vmem>>, vector<256x64xf32>
    %cst_84 = arith.constant dense<0.000000e+00> : vector<16x64xf32>
    %292 = tpu.matmul %290, %291, %cst_84 {dimension_numbers = #tpu.dot_dimension_numbers<[1], [0], [0], [1], [0, 0, 1, 1], [], []>} : vector<16x256xf32>, vector<256x64xf32>, vector<16x64xf32> -> vector<16x64xf32>
    %c23 = arith.constant 23 : index
    %c0_85 = arith.constant 0 : index
    %293 = vector.load %arg5[%c23, %c0_85] : memref<96x256xf32, #tpu.memory_space<vmem>>, vector<1x64xf32>
    %294 = vector.broadcast %293 : vector<1x64xf32> to vector<16x64xf32>
    %295 = arith.addf %292, %294 : vector<16x64xf32>
    %296 = arith.addf %255, %295 : vector<16x64xf32>
    %c24 = arith.constant 24 : index
    %c0_86 = arith.constant 0 : index
    %297 = vector.load %arg5[%c24, %c0_86] : memref<96x256xf32, #tpu.memory_space<vmem>>, vector<1x64xf32>
    %c25 = arith.constant 25 : index
    %c0_87 = arith.constant 0 : index
    %298 = vector.load %arg5[%c25, %c0_87] : memref<96x256xf32, #tpu.memory_space<vmem>>, vector<1x64xf32>
    %cst_88 = arith.constant dense<0.000000e+00> : vector<16xf32>
    %299 = vector.multi_reduction <add>, %296, %cst_88 [1] : vector<16x64xf32> to vector<16xf32>
    %300 = vector.shape_cast %299 : vector<16xf32> to vector<16x1xf32>
    %cst_89 = arith.constant 6.400000e+01 : f32
    %301 = vector.broadcast %cst_89 : f32 to vector<16x1xf32>
    %302 = arith.divf %300, %301 : vector<16x1xf32>
    %303 = vector.broadcast %302 : vector<16x1xf32> to vector<16x64xf32>
    %304 = arith.subf %296, %303 : vector<16x64xf32>
    %305 = arith.mulf %304, %304 : vector<16x64xf32>
    %cst_90 = arith.constant dense<0.000000e+00> : vector<16xf32>
    %306 = vector.multi_reduction <add>, %305, %cst_90 [1] : vector<16x64xf32> to vector<16xf32>
    %307 = vector.shape_cast %306 : vector<16xf32> to vector<16x1xf32>
    %cst_91 = arith.constant 6.400000e+01 : f32
    %308 = vector.broadcast %cst_91 : f32 to vector<16x1xf32>
    %309 = arith.divf %307, %308 : vector<16x1xf32>
    %cst_92 = arith.constant 9.99999997E-7 : f32
    %310 = vector.broadcast %cst_92 : f32 to vector<16x1xf32>
    %311 = arith.addf %309, %310 : vector<16x1xf32>
    %312 = math.rsqrt %311 : vector<16x1xf32>
    %313 = vector.broadcast %312 : vector<16x1xf32> to vector<16x64xf32>
    %314 = arith.mulf %304, %313 : vector<16x64xf32>
    %315 = vector.broadcast %297 : vector<1x64xf32> to vector<16x64xf32>
    %316 = arith.mulf %314, %315 : vector<16x64xf32>
    %317 = vector.broadcast %298 : vector<1x64xf32> to vector<16x64xf32>
    %318 = arith.addf %316, %317 : vector<16x64xf32>
    %c32 = arith.constant 32 : index
    %c0_93 = arith.constant 0 : index
    %319 = vector.load %arg5[%c32, %c0_93] : memref<96x256xf32, #tpu.memory_space<vmem>>, vector<64x128xf32>
    %cst_94 = arith.constant dense<0.000000e+00> : vector<16x128xf32>
    %320 = tpu.matmul %318, %319, %cst_94 {dimension_numbers = #tpu.dot_dimension_numbers<[1], [0], [0], [1], [0, 0, 1, 1], [], []>} : vector<16x64xf32>, vector<64x128xf32>, vector<16x128xf32> -> vector<16x128xf32>
    %c26 = arith.constant 26 : index
    %c0_95 = arith.constant 0 : index
    %321 = vector.load %arg5[%c26, %c0_95] : memref<96x256xf32, #tpu.memory_space<vmem>>, vector<1x128xf32>
    %322 = vector.broadcast %321 : vector<1x128xf32> to vector<16x128xf32>
    %323 = arith.addf %320, %322 : vector<16x128xf32>
    %c0_96 = arith.constant 0 : index
    %c0_97 = arith.constant 0 : index
    %324 = vector.load %arg6[%c0_96, %c0_97] : memref<16x128xf32, #tpu.memory_space<vmem>>, vector<16x128xf32>
    tpu.vector_store %arg6[%c0_96, %c0_97], %323 {strides = array<i32>} : memref<16x128xf32, #tpu.memory_space<vmem>>, vector<16x128xf32>,
    return
  }
  func.func @transform_0(%arg0: i32) -> (i32, i32) {
    %c0_i32 = arith.constant 0 : i32
    %c0_i32_0 = arith.constant 0 : i32
    %c0_i32_1 = arith.constant 0 : i32
    return %c0_i32, %c0_i32_0 : i32, i32
  }
  func.func @transform_1(%arg0: i32) -> (i32, i32) {
    %c0_i32 = arith.constant 0 : i32
    %c0_i32_0 = arith.constant 0 : i32
    %c0_i32_1 = arith.constant 0 : i32
    return %c0_i32, %c0_i32_0 : i32, i32
  }
  func.func @transform_2(%arg0: i32) -> (i32, i32) {
    %c0_i32 = arith.constant 0 : i32
    %c0_i32_0 = arith.constant 0 : i32
    %c0_i32_1 = arith.constant 0 : i32
    return %c0_i32, %c0_i32_0 : i32, i32
  }
  func.func @transform_3(%arg0: i32) -> (i32, i32) {
    %c0_i32 = arith.constant 0 : i32
    %c0_i32_0 = arith.constant 0 : i32
    %c0_i32_1 = arith.constant 0 : i32
    return %c0_i32, %c0_i32_0 : i32, i32
  }
  func.func @transform_4(%arg0: i32) -> (i32, i32) {
    %c0_i32 = arith.constant 0 : i32
    %c0_i32_0 = arith.constant 0 : i32
    %c0_i32_1 = arith.constant 0 : i32
    return %c0_i32, %c0_i32_0 : i32, i32
  }
  func.func @transform_5(%arg0: i32) -> (i32, i32) {
    %c0_i32 = arith.constant 0 : i32
    %c0_i32_0 = arith.constant 0 : i32
    %c0_i32_1 = arith.constant 0 : i32
    return %c0_i32, %c0_i32_0 : i32, i32
  }
}

</mosaic_0001>

<bundles_post_ra>
// kernel: noise_vit_forward.1
= control target key start
LH: loop header
LB: loop body
LE: loop exit
PB: predicated region body
PF: predicated region fallthrough
CT: control target
= control target key end

     0   :  { %v5287_v0 = vmov 0.0|0.0   ;;  %vm48_vm0 = vcmask 523264   ;;  %vm5289_vm1 = vmmov 0   ;;  %s5290_s12 = smov 112   ;;  %s5291_s13 = smov 80   ;;  %vm320_vm2 = vcmask 130048   ;;  %s6353_s1 = inlined_call_operand.vmem [shape: f32[832,64], index: 1, kind: input, shape index: {}]   ;;  %s6354_s0 = inlined_call_operand.vmem [shape: f32[16,192], index: 0, kind: input, shape index: {}]   ;;  %s6355_s4 = inlined_call_operand.vmem [shape: f32[96,256], index: 4, kind: input, shape index: {}]   ;;  %s6356_s2 = inlined_call_operand.vmem [shape: f32[128,192], index: 2, kind: input, shape index: {}]   ;;  %s6357_s3 = inlined_call_operand.vmem [shape: f32[128,256], index: 3, kind: input, shape index: {}]   ;;  %s6358_s5 = inlined_call_operand.vmem [shape: f32[16,128], index: 5, kind: output, shape index: {}]  }
   0x1   :  { %4955 = vmatprep.subr.bf16.mxu0 %v5287_v0  ;;  %v24_v1 = vld [vmem:[%s6353_s1] sm:$0xff]  ;;  %v25_v2 = vld [vmem:[%s6353_s1 + $0x8] sm:$0xff]  ;;  %v26_v3 = vld [vmem:[%s6353_s1 + $0x10] sm:$0xff]  ;;  %s5292_s14 = smov 64   ;;  %s5293_s15 = smov 96   ;;  %vm943_vm4 = vcmask 64512  }
   0x2   :  { %v4956_v4 = vpack.c.bf16 %v25_v2, %v24_v1  ;;  %v27_v5 = vld [vmem:[%s6353_s1 + $0x18] sm:$0xff]  ;;  %v28_v7 = vld [vmem:[%s6353_s1 + $0x20] sm:$0xff]  ;;  %v29_v8 = vld [vmem:[%s6353_s1 + $0x28] sm:$0xff] }
   0x3   :  { %v4959_v6 = vpack.c.bf16 %v27_v5, %v26_v3  ;;  %v4962_v9 = vpack.c.bf16 %v29_v8, %v28_v7  ;;  %v30_v10 = vld [vmem:[%s6353_s1 + $0x30] sm:$0xff]  ;;  %v31_v11 = vld [vmem:[%s6353_s1 + $0x38] sm:$0xff]  ;;  %v21_v12 = vld [vmem:[%s6354_s0 + $0x8] sm:$0xff] }
   0x4   :  { %4957 = vmatpush1.bf16.msra.mxu0 %v4956_v4  ;;  %4458 = vmatprep.mubr.msk.f32.mxu0 %vm48_vm0, %v21_v12  ;;  %v4965_v13 = vpack.c.bf16 %v31_v11, %v30_v10  ;;  %v32_v14 = vld [vmem:[%s6353_s1 + $0x40] sm:$0xff]  ;;  %v33_v15 = vld [vmem:[%s6353_s1 + $0x48] sm:$0xff]  ;;  %v34_v17 = vld [vmem:[%s6353_s1 + $0x50] sm:$0xff] }
   0x5   :  { %4958 = vmatprep.subr.bf16.mxu0 %v5287_v0  ;;  %v4968_v16 = vpack.c.bf16 %v33_v15, %v32_v14  ;;  %v35_v18 = vld [vmem:[%s6353_s1 + $0x58] sm:$0xff]  ;;  %v36_v20 = vld [vmem:[%s6353_s1 + $0x60] sm:$0xff]  ;;  %v37_v21 = vld [vmem:[%s6353_s1 + $0x68] sm:$0xff]  ;;  %v5288_v15 = vmov 0.0  }
   0x6   :  { %v4971_v19 = vpack.c.bf16 %v35_v18, %v34_v17  ;;  %v4974_v22 = vpack.c.bf16 %v37_v21, %v36_v20  ;;  %v38_v23 = vld [vmem:[%s6353_s1 + $0x70] sm:$0xff]  ;;  %v39_v24 = vld [vmem:[%s6353_s1 + $0x78] sm:$0xff]  ;;  %v40_v26 = vld [vmem:[%s6353_s1 + $0x80] sm:$0xff]  ;;  %271 = vmatprep.mubr.f32.mxu1 %v5288_v15 }
   0x7   :  { %v4977_v25 = vpack.c.bf16 %v39_v24, %v38_v23  ;;  %v41_v27 = vld [vmem:[%s6353_s1 + $0x88] sm:$0xff]  ;;  %v42_v29 = vld [vmem:[%s6353_s1 + $0x90] sm:$0xff]  ;;  %v43_v30 = vld [vmem:[%s6353_s1 + $0x98] sm:$0xff] }
   0x8   :  { %4960 = vmatpush1.bf16.msra.mxu0 %v4959_v6  ;;  %v4980_v28 = vpack.c.bf16 %v41_v27, %v40_v26  ;;  %v4983_v31 = vpack.c.bf16 %v43_v30, %v42_v29  ;;  %v44_v32 = vld [vmem:[%s6353_s1 + $0xa0] sm:$0xff]  ;;  %v45_v33 = vld [vmem:[%s6353_s1 + $0xa8] sm:$0xff]  ;;  %v46_v35 = vld [vmem:[%s6353_s1 + $0xb0] sm:$0xff] }
   0x9   :  { %4961 = vmatprep.subr.bf16.mxu0 %v5287_v0  ;;  %v4986_v34 = vpack.c.bf16 %v45_v33, %v44_v32  ;;  %v47_v36 = vld [vmem:[%s6353_s1 + $0xb8] sm:$0xff]  ;;  %v20_v38 = vld [vmem:[%s6354_s0] sm:$0xff]  ;;  %v22_v40 = vld [vmem:[%s6354_s0 + $0x10] sm:$0xff] }
   0xa   :  { %v4989_v37 = vpack.c.bf16 %v47_v36, %v46_v35  ;;  %v23_v39 = vld [vmem:[%s6354_s0 + $0x18] sm:$0xff]  ;;  %v130_v41 = vld [vmem:[%s6355_s4] sm:$0xff]  ;;  %v173_v60 = vld [vmem:[%s6356_s2 + $0x8] sm:$0xff] }
   0xb   :  { %v175_v61 = vld [vmem:[%s6356_s2 + $0x18] sm:$0xff]  ;;  %v172_v63 = vld [vmem:[%s6356_s2] sm:$0xff]  ;;  %v177_v2 = vld [vmem:[%s6356_s2 + $0x28] sm:$0xff] }
   0xc   :  { %4963 = vmatpush1.bf16.msra.mxu0 %v4962_v9  ;;  %v4991_v62 = vpack.c.bf16 %v175_v61, %v173_v60  ;;  %v179_v3 = vld [vmem:[%s6356_s2 + $0x38] sm:$0xff]  ;;  %v176_v5 = vld [vmem:[%s6356_s2 + $0x20] sm:$0xff]  ;;  %v178_v6 = vld [vmem:[%s6356_s2 + $0x30] sm:$0xff] }
   0xd   :  { %4964 = vmatprep.subr.bf16.mxu0 %v5287_v0  ;;  %v4995_v4 = vpack.c.bf16 %v179_v3, %v177_v2  ;;  %v4997_v7 = vpack.c.bf16 %v178_v6, %v176_v5  ;;  %v181_v8 = vld [vmem:[%s6356_s2 + $0x48] sm:$0xff]  ;;  %v183_v9 = vld [vmem:[%s6356_s2 + $0x58] sm:$0xff]  ;;  %v180_v10 = vld [vmem:[%s6356_s2 + $0x40] sm:$0xff]  ;;  %v5294_v5 = vmov -1e+30  }
   0xe   :  { %4992 = vmatprep.subr.bf16.mxu1 %v4991_v62  ;;  %v4999_v11 = vpack.c.bf16 %v183_v9, %v181_v8  ;;  %v182_v12 = vld [vmem:[%s6356_s2 + $0x50] sm:$0xff]  ;;  %v187_v14 = vld [vmem:[%s6356_s2 + $0x78] sm:$0xff]  ;;  %v184_v18 = vld [vmem:[%s6356_s2 + $0x60] sm:$0xff] }
   0xf   :  { %v140_v30 = vld [vmem:[%s6355_s4 + $0x11] ss:$0 sm:$0xff] }
  0x10   :  { %4966 = vmatpush1.bf16.msra.mxu0 %v4965_v13  ;;  %v185_v13 = vld [vmem:[%s6356_s2 + $0x68] sm:$0xff] }
  0x11   :  { %4967 = vmatprep.subr.bf16.mxu0 %v5287_v0  ;;  %v5003_v17 = vpack.c.bf16 %v187_v14, %v185_v13 }
  0x14   :  { %4969 = vmatpush1.bf16.msra.mxu0 %v4968_v16  ;;  %v5001_v16 = vpack.c.bf16 %v182_v12, %v180_v10 }
  0x15   :  { %4970 = vmatprep.subr.bf16.mxu0 %v5287_v0 }
  0x18   :  { %4972 = vmatpush1.bf16.msra.mxu0 %v4971_v19  ;;  %v186_v19 = vld [vmem:[%s6356_s2 + $0x70] sm:$0xff] }
  0x19   :  { %4973 = vmatprep.subr.bf16.mxu0 %v5287_v0  ;;  %v5005_v20 = vpack.c.bf16 %v186_v19, %v184_v18 }
  0x1c   :  { %4975 = vmatpush1.bf16.msra.mxu0 %v4974_v22 }
  0x1d   :  { %4976 = vmatprep.subr.bf16.mxu0 %v5287_v0 }
  0x20   :  { %4978 = vmatpush1.bf16.msra.mxu0 %v4977_v25 }
  0x21   :  { %4979 = vmatprep.subr.bf16.mxu0 %v5287_v0 }
  0x24   :  { %4981 = vmatpush1.bf16.msra.mxu0 %v4980_v28  ;;  %v139_v28 = vld [vmem:[%s6355_s4 + $0x10] ss:$0 sm:$0xff] }
  0x25   :  { %4982 = vmatprep.subr.bf16.mxu0 %v5287_v0 }
  0x28   :  { %4984 = vmatpush1.bf16.msra.mxu0 %v4983_v31 }
  0x29   :  { %4985 = vmatprep.subr.bf16.mxu0 %v5287_v0 }
  0x2c   :  { %4987 = vmatpush1.bf16.msra.mxu0 %v4986_v34 }
  0x2d   :  { %4988 = vmatprep.subr.bf16.mxu0 %v5287_v0  ;;  %v174_v0 = vld [vmem:[%s6356_s2 + $0x10] sm:$0xff] }
  0x2e   :  { %v4993_v1 = vpack.c.bf16 %v174_v0, %v172_v63 }
  0x30   :  { %4990 = vmatpush1.bf16.msra.mxu0 %v4989_v37  ;;  %4994 = vmatpush1.bf16.msra.mxu1 %v4993_v1  ;;  %v133_v37 = vlaneseq }
  0x31   :  { %4996 = vmatprep.subr.bf16.mxu1 %v4995_v4  ;;  %4780 = vmatprep.subr.mxu0 %v5288_v15 }
  0x32   :  { %v134_v4 = vand.u32 127, %v133_v37 }
  0x33   :  { %120 = vmatmul.mubr.f32.vlgmr.msra.gmra.mrb[0].mxu0 %v20_v38  ;;  %v5499_v38 = vshrl.u32 %v133_v37, 7 }
  0x34   :  { %4459 = vmatprep.mubr.msk.f32.mxu0 %vm48_vm0, %v23_v39  ;;  %4998 = vmatpush1.bf16.msra.mxu1 %v4997_v7  ;;  %vm135_vm3 = vcmp.lt.s32.totalorder %v134_v4, 5 }
  0x35   :  { %5000 = vmatprep.subr.bf16.mxu1 %v4999_v11  ;;  %v5502_v39 = vsub.s32 0, %v5499_v38  ;;  %v5584_v6 = vsel %vm135_vm3, 0.0, %v5294_v5  ;;  %vm2266_vm5 = vcmp.eq.s32.totalorder %v5499_v38, 0 }
  0x37   :  { %125 = vmatmul.mubr.f32.gmra.mrb[2].mxu0 %v22_v40  ;;  %v4460_v40 = vld [vmem:[%s6355_s4 + $0x12] ss:$8 sm:$0x3] }
  0x38   :  { %5002 = vmatpush1.bf16.msra.mxu1 %v5001_v16  ;;  %4782 = vmatprep.mubr.msk.f32.mxu0 %vm5289_vm1, %v5288_v15 }
  0x39   :  { %5004 = vmatprep.subr.bf16.mxu1 %v5003_v17 }
  0x3c   :  { %5006 = vmatpush1.bf16.msra.mxu1 %v5005_v20 }
  0x3d   :  { %4720 = vmatprep.subr.mxu1 %v5288_v15 }
 0x106   :  { %v121_v42 = vpop.f32.mrb[0].mxu0 }
 0x107   :  { %v5426_v43 = vadd.f32 %v130_v41, %v121_v42  ;;  %v123_v44 = vpop.f32.mrb[1].mxu0 }
 0x108   :  { %v5513_v44 = vsub.s32 1, %v5499_v38 }
 0x109   :  { %v141_v45 = vsel %vm48_vm0, %v5426_v43, 0.0 }
 0x10a   :  { %142 = vadd.xlane.f32.xlu0 %v141_v45  ;;  %v126_v46 = vpop.f32.mrb[2].mxu0 }
 0x10b   :  { %v5430_v47 = vadd.f32 %v130_v41, %v126_v46  ;;  %v128_v48 = vpop.f32.mrb[3].mxu0  ;;  %v194_v41 = vrot.slane %v4460_v40, %v5502_v39 }
 0x10c   :  { %v5519_v48 = vrot.slane %v4460_v40, %v5513_v44 }
 0x10d   :  { %v144_v49 = vsel %vm48_vm0, %v5430_v47, 0.0 }
 0x10e   :  { %145 = vadd.xlane.f32.xlu0 %v144_v49 }
 0x197   :  { %v143_v50 = vpop.xlane.xlu0 %142 }
 0x198   :  { %v148_v51 = vmul.f32 0.015625, %v143_v50 }
 0x19a   :  { %v150_v52 = vsub.f32 %v5426_v43, %v148_v51 }
 0x19b   :  { %v146_v53 = vpop.xlane.xlu0 %145 }
 0x19c   :  { %v149_v54 = vmul.f32 0.015625, %v146_v53  ;;  %v152_v55 = vmul.f32 %v150_v52, %v150_v52 }
 0x19e   :  { %v151_v56 = vsub.f32 %v5430_v47, %v149_v54  ;;  %v154_v57 = vsel %vm48_vm0, %v152_v55, 0.0 }
 0x19f   :  { %155 = vadd.xlane.f32.xlu1 %v154_v57 }
 0x1a0   :  { %v153_v58 = vmul.f32 %v151_v56, %v151_v56 }
 0x1a2   :  { %v157_v59 = vsel %vm48_vm0, %v153_v58, 0.0 }
 0x1a3   :  { %158 = vadd.xlane.f32.xlu1 %v157_v59 }
 0x22c   :  { %v156_v21 = vpop.xlane.xlu1 %155 }
 0x22d   :  { %v160_v22 = vmul.f32 0.015625, %v156_v21 }
 0x22f   :  { %v162_v23 = vadd.f32 1e-06, %v160_v22 }
 0x230   :  { %v159_v24 = vpop.xlane.xlu1 %158 }
 0x231   :  { %5187 = vrsqrt.f32 %v162_v23  ;;  %v161_v25 = vmul.f32 0.015625, %v159_v24 }
 0x233   :  { %v163_v26 = vadd.f32 1e-06, %v161_v25 }
 0x235   :  { %5189 = vrsqrt.f32 %v163_v26 }
 0x23b   :  { %v5188_v27 = vpop.eup %5187 }
 0x23c   :  { %v166_v29 = vmul.f32 %v5188_v27, %v150_v52 }
 0x23e   :  { %v168_v31 = vmul.f32 %v166_v29, %v139_v28 }
 0x23f   :  { %v5190_v32 = vpop.eup %5189 }
 0x240   :  { %v170_v33 = vadd.f32 %v168_v31, %v140_v30  ;;  %v167_v34 = vmul.f32 %v5190_v32, %v151_v56 }
 0x242   :  { %4461 = vmatmul.mubr.msk.f32.vlgmr.msra.gmra.mrb[0].mxu1 %vm48_vm0, %v170_v33  ;;  %v169_v35 = vmul.f32 %v167_v34, %v139_v28 }
 0x243   :  { %277 = vmatprep.mubr.f32.mxu1 %v5288_v15 }
 0x244   :  { %v171_v36 = vadd.f32 %v169_v35, %v140_v30 }
 0x246   :  { %4462 = vmatmul.mubr.msk.f32.gmra.mrb[2].mxu1 %vm48_vm0, %v171_v36 }
 0x247   :  { %4722 = vmatprep.mubr.msk.f32.mxu1 %vm5289_vm1, %v5288_v15 }
 0x315   :  { %v273_v42 = vpop.f32.mrb[0].mxu1 }
 0x316   :  { %v274_v45 = vadd.f32 %v273_v42, %v194_v41  ;;  %v5515_v46 = vpop.f32.mrb[1].mxu1 }
 0x317   :  { %v5576_v3 = vadd.f32 %v5515_v46, %v5519_v48 }
 0x318   :  { %286 = vrot.lane.b32.xlu0 %v274_v45, %s5290_s12 }
 0x319   :  { %v279_v49 = vpop.f32.mrb[2].mxu1 }
 0x31a   :  { %v280_v50 = vadd.f32 %v279_v49, %v194_v41  ;;  %v281_v51 = vpop.f32.mrb[3].mxu1 }
 0x31b   :  { %v5522_v52 = vadd.f32 %v281_v51, %v5519_v48 }
 0x31c   :  { %294 = vrot.lane.b32.xlu0 %v274_v45, %s5291_s13  ;;  %288 = vrot.lane.b32.xlu1 %v280_v50, %s5290_s12 }
 0x320   :  { %318 = vrot.lane.b32.xlu0 %v274_v45, %s5292_s14  ;;  %290 = vrot.lane.b32.xlu1 %v274_v45, %s5293_s15 }
 0x324   :  { %292 = vrot.lane.b32.xlu1 %v280_v50, %s5293_s15 }
 0x328   :  { %296 = vrot.lane.b32.xlu1 %v280_v50, %s5291_s13 }
 0x32c   :  { %395 = vrot.lane.b32.xlu1 %v280_v50, %s5292_s14 }
 0x38a   :  { %v287_v53 = vpop.permute.xlu0 %286 }
 0x38b   :  { %471 = vrot.lane.b32.xlu0 %v287_v53, %s5292_s14 }
 0x38e   :  { %v289_v54 = vpop.permute.xlu1 %288  ;;  %v295_v55 = vpop.permute.xlu0 %294 }
 0x38f   :  { %547 = vrot.lane.b32.xlu1 %v289_v54, %s5292_s14 }
 0x392   :  { %v291_v56 = vpop.permute.xlu1 %290  ;;  %v319_v57 = vpop.permute.xlu0 %318 }
 0x393   :  { %623 = vrot.lane.b32.xlu0 %v291_v56, %s5292_s14  ;;  %4721 = vmatpush3.xpose.msk.msra.mxu1 %vm320_vm2, %v319_v57 }
 0x394   :  { %4725 = vmatprep.subr.mxu1 %v5288_v15 }
 0x396   :  { %v293_v58 = vpop.permute.xlu1 %292  ;;  %4723 = vmatmul.mubr.msk.f32.vlgmr.msra.gmra.mrb[4].mxu1 %vm320_vm2, %v274_v45 }
 0x397   :  { %699 = vrot.lane.b32.xlu1 %v293_v58, %s5292_s14  ;;  %775 = vrot.lane.b32.xlu0 %v295_v55, %s5292_s14 }
 0x398   :  { %4727 = vmatprep.mubr.msk.f32.mxu1 %vm5289_vm1, %v5288_v15 }
 0x39a   :  { %v297_v59 = vpop.permute.xlu1 %296 }
 0x39b   :  { %851 = vrot.lane.b32.xlu1 %v297_v59, %s5292_s14 }
 0x39e   :  { %v396_v60 = vpop.permute.xlu1 %395 }
 0x39f   :  { %4726 = vmatpush3.xpose.msk.msra.mxu1 %vm320_vm2, %v396_v60 }
 0x3a0   :  { %4730 = vmatprep.subr.mxu1 %v5288_v15 }
 0x3a2   :  { %4728 = vmatmul.mubr.msk.f32.vlgmr.msra.gmra.mrb[6].mxu1 %vm320_vm2, %v280_v50 }
 0x3a3   :  { %4732 = vmatprep.mubr.msk.f32.mxu1 %vm5289_vm1, %v5288_v15 }
 0x3fd   :  { %v472_v61 = vpop.permute.xlu0 %471 }
 0x3fe   :  { %4731 = vmatpush3.xpose.msk.msra.mxu1 %vm320_vm2, %v472_v61 }
 0x3ff   :  { %4735 = vmatprep.subr.mxu1 %v5288_v15 }
 0x401   :  { %v548_v62 = vpop.permute.xlu1 %547  ;;  %4733 = vmatmul.mubr.msk.f32.vlgmr.msra.gmra.mrb[8].mxu1 %vm320_vm2, %v287_v53 }
 0x402   :  { %4736 = vmatpush3.xpose.msk.msra.mxu1 %vm320_vm2, %v548_v62  ;;  %4737 = vmatprep.mubr.msk.f32.mxu1 %vm5289_vm1, %v5288_v15 }
 0x403   :  { %4740 = vmatprep.subr.mxu1 %v5288_v15 }
 0x405   :  { %4738 = vmatmul.mubr.msk.f32.vlgmr.msra.gmra.mrb[10].mxu1 %vm320_vm2, %v289_v54  ;;  %v624_v63 = vpop.permute.xlu0 %623 }
 0x406   :  { %4741 = vmatpush3.xpose.msk.msra.mxu1 %vm320_vm2, %v624_v63  ;;  %4742 = vmatprep.mubr.msk.f32.mxu1 %vm5289_vm1, %v5288_v15 }
 0x407   :  { %4745 = vmatprep.subr.mxu1 %v5288_v15 }
 0x409   :  { %v700_v0 = vpop.permute.xlu1 %699  ;;  %4743 = vmatmul.mubr.msk.f32.vlgmr.msra.gmra.mrb[12].mxu1 %vm320_vm2, %v291_v56  ;;  %v776_v1 = vpop.permute.xlu0 %775 }
 0x40a   :  { %4746 = vmatpush3.xpose.msk.msra.mxu1 %vm320_vm2, %v700_v0  ;;  %4747 = vmatprep.mubr.msk.f32.mxu1 %vm5289_vm1, %v5288_v15 }
 0x40b   :  { %4750 = vmatprep.subr.mxu1 %v5288_v15 }
 0x40d   :  { %4748 = vmatmul.mubr.msk.f32.vlgmr.msra.gmra.mrb[14].mxu1 %vm320_vm2, %v293_v58  ;;  %v852_v2 = vpop.permute.xlu1 %851 }
 0x40e   :  { %4751 = vmatpush3.xpose.msk.msra.mxu1 %vm320_vm2, %v776_v1  ;;  %4752 = vmatprep.mubr.msk.f32.mxu1 %vm5289_vm1, %v5288_v15 }
 0x40f   :  { %4755 = vmatprep.subr.mxu1 %v5288_v15 }
 0x411   :  { %4753 = vmatmul.mubr.msk.f32.vlgmr.msra.gmra.mrb[16].mxu1 %vm320_vm2, %v295_v55 }
 0x412   :  { %4756 = vmatpush3.xpose.msk.msra.mxu1 %vm320_vm2, %v852_v2  ;;  %4757 = vmatprep.mubr.msk.f32.mxu1 %vm5289_vm1, %v5288_v15 }
 0x413   :  { %4760 = vmatprep.subr.mxu1 %v5288_v15 }
 0x415   :  { %4758 = vmatmul.mubr.msk.f32.vlgmr.msra.gmra.mrb[18].mxu1 %vm320_vm2, %v297_v59 }
 0x416   :  { %4761 = vmatpush3.msra.mxu1 %v5576_v3  ;;  %4762 = vmatprep.mubr.msk.f32.mxu1 %vm5289_vm1, %v5288_v15 }
 0x417   :  { %4765 = vmatprep.subr.mxu1 %v5288_v15 }
 0x469   :  { %v391_v7 = vpop.f32.mrb[4].mxu1 }
 0x46a   :  { %v927_v8 = vmul.f32 0.25, %v391_v7  ;;  %v4724_v9 = vpop.f32.mrb[5].mxu1 }
 0x46c   :  { %v935_v10 = vadd.f32 %v927_v8, %v5584_v6 }
 0x46e   :  { %v944_v11 = vsel %vm943_vm4, %v935_v10, -inf }
 0x46f   :  { %945 = vmax.xlane.f32.xlu0 %v944_v11 }
 0x475   :  { %v467_v12 = vpop.f32.mrb[6].mxu1 }
 0x476   :  { %v928_v13 = vmul.f32 0.25, %v467_v12  ;;  %v4729_v14 = vpop.f32.mrb[7].mxu1 }
 0x478   :  { %v936_v16 = vadd.f32 %v928_v13, %v5584_v6 }
 0x47a   :  { %v947_v17 = vsel %vm943_vm4, %v936_v16, -inf }
 0x47b   :  { %948 = vmax.xlane.f32.xlu1 %v947_v17 }
 0x4d4   :  { %v543_v18 = vpop.f32.mrb[8].mxu1 }
 0x4d5   :  { %v929_v19 = vmul.f32 0.25, %v543_v18  ;;  %v4734_v20 = vpop.f32.mrb[9].mxu1 }
 0x4d7   :  { %v937_v21 = vadd.f32 %v929_v19, %v5584_v6 }
 0x4d8   :  { %v619_v22 = vpop.f32.mrb[10].mxu1 }
 0x4d9   :  { %v930_v23 = vmul.f32 0.25, %v619_v22  ;;  %v4739_v24 = vpop.f32.mrb[11].mxu1  ;;  %v950_v25 = vsel %vm943_vm4, %v937_v21, -inf }
 0x4da   :  { %951 = vmax.xlane.f32.xlu0 %v950_v25 }
 0x4db   :  { %v938_v26 = vadd.f32 %v930_v23, %v5584_v6 }
 0x4dc   :  { %v695_v27 = vpop.f32.mrb[12].mxu1 }
 0x4dd   :  { %v931_v28 = vmul.f32 0.25, %v695_v27  ;;  %v4744_v29 = vpop.f32.mrb[13].mxu1  ;;  %v953_v30 = vsel %vm943_vm4, %v938_v26, -inf }
 0x4de   :  { %954 = vmax.xlane.f32.xlu0 %v953_v30 }
 0x4df   :  { %v939_v31 = vadd.f32 %v931_v28, %v5584_v6 }
 0x4e0   :  { %v771_v32 = vpop.f32.mrb[14].mxu1 }
 0x4e1   :  { %v932_v33 = vmul.f32 0.25, %v771_v32  ;;  %v4749_v34 = vpop.f32.mrb[15].mxu1  ;;  %v956_v35 = vsel %vm943_vm4, %v939_v31, -inf }
 0x4e2   :  { %957 = vmax.xlane.f32.xlu0 %v956_v35 }
 0x4e3   :  { %v940_v36 = vadd.f32 %v932_v33, %v5584_v6 }
 0x4e4   :  { %v847_v37 = vpop.f32.mrb[16].mxu1 }
 0x4e5   :  { %v933_v40 = vmul.f32 0.25, %v847_v37  ;;  %v4754_v41 = vpop.f32.mrb[17].mxu1  ;;  %v959_v42 = vsel %vm943_vm4, %v940_v36, -inf }
 0x4e6   :  { %960 = vmax.xlane.f32.xlu1 %v959_v42 }
 0x4e7   :  { %v941_v45 = vadd.f32 %v933_v40, %v5584_v6 }
 0x4e8   :  { %v923_v46 = vpop.f32.mrb[18].mxu1 }
 0x4e9   :  { %v934_v48 = vmul.f32 0.25, %v923_v46  ;;  %v4759_v49 = vpop.f32.mrb[19].mxu1  ;;  %v962_v50 = vsel %vm943_vm4, %v941_v45, -inf }
 0x4ea   :  { %963 = vmax.xlane.f32.xlu0 %v962_v50 }
 0x4eb   :  { %v942_v51 = vadd.f32 %v934_v48, %v5584_v6 }
 0x4ed   :  { %v965_v53 = vsel %vm943_vm4, %v942_v51, -inf }
 0x4ee   :  { %966 = vmax.xlane.f32.xlu1 %v965_v53 }
 0x4fc   :  { %v946_v54 = vpop.xlane.xlu0 %945 }
 0x4fd   :  { %v968_v55 = vsub.f32 %v935_v10, %v946_v54 }
 0x4ff   :  { %v976_v56 = vmul.f32 1.442695, %v968_v55 }
 0x501   :  { %5191 = vpow2.f32 %v976_v56 }
 0x508   :  { %v949_v57 = vpop.xlane.xlu1 %948 }
 0x509   :  { %v969_v58 = vsub.f32 %v936_v16, %v949_v57 }
 0x50b   :  { %v5192_v59 = vpop.eup %5191  ;;  %v978_v60 = vmul.f32 1.442695, %v969_v58 }
 0x50c   :  { %v992_v61 = vsel %vm943_vm4, %v5192_v59, 0.0 }
 0x50d   :  { %5193 = vpow2.f32 %v978_v60  ;;  %993 = vadd.xlane.f32.xlu0 %v992_v61 }
 0x517   :  { %v5194_v62 = vpop.eup %5193 }
 0x518   :  { %v995_v63 = vsel %vm943_vm4, %v5194_v62, 0.0 }
 0x519   :  { %996 = vadd.xlane.f32.xlu1 %v995_v63 }
 0x52a   :  { %302 = vrot.lane.b32.xlu1 %v5522_v52, %s5290_s12 }
 0x567   :  { %v952_v0 = vpop.xlane.xlu0 %951 }
 0x568   :  { %v970_v1 = vsub.f32 %v937_v21, %v952_v0 }
 0x56a   :  { %v980_v2 = vmul.f32 1.442695, %v970_v1 }
 0x56b   :  { %v955_v4 = vpop.xlane.xlu0 %954 }
 0x56c   :  { %5195 = vpow2.f32 %v980_v2  ;;  %v971_v5 = vsub.f32 %v938_v26, %v955_v4  ;;  %v1618_v4 = vld [vmem:[%s6353_s1 + $0xd0] sm:$0xff] }
 0x56e   :  { %v982_v7 = vmul.f32 1.442695, %v971_v5  ;;  %v1619_v5 = vld [vmem:[%s6353_s1 + $0xd8] sm:$0xff] }
 0x56f   :  { %v958_v12 = vpop.xlane.xlu0 %957 }
 0x570   :  { %5197 = vpow2.f32 %v982_v7  ;;  %v972_v14 = vsub.f32 %v939_v31, %v958_v12  ;;  %v5007_v7 = vpack.c.bf16 %v1619_v5, %v1618_v4  ;;  %v1998_v4 = vld [vmem:[%s6357_s3 + $0x48] sm:$0xff]  ;;  %v2000_v5 = vld [vmem:[%s6357_s3 + $0x58] sm:$0xff] }
 0x572   :  { %v984_v18 = vmul.f32 1.442695, %v972_v14 }
 0x573   :  { %v961_v16 = vpop.xlane.xlu1 %960 }
 0x574   :  { %v973_v19 = vsub.f32 %v940_v36, %v961_v16 }
 0x576   :  { %v5196_v8 = vpop.eup %5195  ;;  %v986_v21 = vmul.f32 1.442695, %v973_v19 }
 0x577   :  { %v998_v9 = vsel %vm943_vm4, %v5196_v8, 0.0  ;;  %v964_v13 = vpop.xlane.xlu0 %963 }
 0x578   :  { %999 = vadd.xlane.f32.xlu0 %v998_v9  ;;  %v974_v20 = vsub.f32 %v941_v45, %v964_v13  ;;  %v1617_v9 = vld [vmem:[%s6353_s1 + $0xc8] sm:$0xff] }
 0x57a   :  { %v5607_v10 = vpop.eup %5197  ;;  %v988_v23 = vmul.f32 1.442695, %v974_v20 }
 0x57b   :  { %v1001_v11 = vsel %vm943_vm4, %v5607_v10, 0.0  ;;  %v967_v22 = vpop.xlane.xlu1 %966 }
 0x57c   :  { %1002 = vadd.xlane.f32.xlu1 %v1001_v11  ;;  %v975_v24 = vsub.f32 %v942_v51, %v967_v22 }
 0x57e   :  { %v990_v28 = vmul.f32 1.442695, %v975_v24  ;;  %v1623_v24 = vld [vmem:[%s6353_s1 + $0xf8] sm:$0xff] }
 0x58d   :  { %308 = vrot.lane.b32.xlu1 %v5522_v52, %s5293_s15 }
 0x58e   :  { %300 = vrot.lane.b32.xlu0 %v5576_v3, %s5290_s12 }
 0x59a   :  { %v994_v17 = vpop.xlane.xlu0 %993 }
 0x59b   :  { %5199 = vrcp.f32 %v994_v17  ;;  %v1620_v17 = vld [vmem:[%s6353_s1 + $0xe0] sm:$0xff] }
 0x59c   :  { %5201 = vpow2.f32 %v984_v18  ;;  %v1621_v18 = vld [vmem:[%s6353_s1 + $0xe8] sm:$0xff] }
 0x59d   :  { %5203 = vpow2.f32 %v986_v21  ;;  %v5015_v20 = vpack.c.bf16 %v1621_v18, %v1620_v17  ;;  %v2137_v18 = vld [vmem:[%s6353_s1 + $0x180] sm:$0xff] }
 0x59e   :  { %5205 = vpow2.f32 %v988_v23  ;;  %v1622_v23 = vld [vmem:[%s6353_s1 + $0xf0] sm:$0xff] }
 0x5a5   :  { %v5200_v25 = vpop.eup %5199 }
 0x5a6   :  { %v1024_v26 = vmul.f32 %v5200_v25, %v5192_v59  ;;  %v997_v27 = vpop.xlane.xlu1 %996  ;;  %v5202_v29 = vpop.eup %5201  ;;  %v5019_v25 = vpack.c.bf16 %v1623_v24, %v1622_v23  ;;  %v2139_v23 = vld [vmem:[%s6353_s1 + $0x190] sm:$0xff]  ;;  %v2140_v24 = vld [vmem:[%s6353_s1 + $0x198] sm:$0xff] }
 0x5a7   :  { %5207 = vrcp.f32 %v997_v27  ;;  %v1004_v30 = vsel %vm943_vm4, %v5202_v29, 0.0  ;;  %v5204_v31 = vpop.eup %5203 }
 0x5a8   :  { %4763 = vmatmul.mubr.msk.f32.vlgmr.msra.gmra.mrb[20].mxu1 %vm943_vm4, %v1024_v26  ;;  %5209 = vpow2.f32 %v990_v28  ;;  %v5206_v32 = vpop.eup %5205  ;;  %v1007_v33 = vsel %vm943_vm4, %v5204_v31, 0.0 }
 0x5a9   :  { %4766 = vmatpush3.msra.mxu1 %v5522_v52  ;;  %4767 = vmatprep.mubr.msk.f32.mxu1 %vm5289_vm1, %v5288_v15  ;;  %v1010_v36 = vsel %vm943_vm4, %v5206_v32, 0.0 }
 0x5aa   :  { %4770 = vmatprep.subr.mxu1 %v5288_v15  ;;  %v303_v41 = vpop.permute.xlu1 %302 }
 0x5ad   :  { %1005 = vadd.xlane.f32.xlu0 %v1004_v30 }
 0x5b1   :  { %v5208_v34 = vpop.eup %5207  ;;  %1008 = vadd.xlane.f32.xlu1 %v1007_v33 }
 0x5b2   :  { %v1025_v35 = vmul.f32 %v5208_v34, %v5194_v62  ;;  %v5210_v37 = vpop.eup %5209 }
 0x5b3   :  { %v1013_v40 = vsel %vm943_vm4, %v5210_v37, 0.0 }
 0x5b4   :  { %4768 = vmatmul.mubr.msk.f32.vlgmr.msra.gmra.mrb[22].mxu1 %vm943_vm4, %v1025_v35  ;;  %v1954_v35 = vld [vmem:[%s6355_s4 + $0x13] ss:$0 sm:$0xff] }
 0x5b5   :  { %1011 = vadd.xlane.f32.xlu1 %v1010_v36  ;;  %4772 = vmatprep.mubr.msk.f32.mxu1 %vm5289_vm1, %v5288_v15 }
 0x5b9   :  { %1014 = vadd.xlane.f32.xlu1 %v1013_v40 }
 0x5c3   :  { %306 = vrot.lane.b32.xlu0 %v5576_v3, %s5293_s15 }
 0x5c7   :  { %312 = vrot.lane.b32.xlu0 %v5576_v3, %s5291_s13 }
 0x5ca   :  { %314 = vrot.lane.b32.xlu1 %v5522_v52, %s5291_s13 }
 0x605   :  { %v1000_v42 = vpop.xlane.xlu0 %999 }
 0x606   :  { %5211 = vrcp.f32 %v1000_v42 }
 0x609   :  { %v1003_v45 = vpop.xlane.xlu1 %1002  ;;  %v301_v46 = vpop.permute.xlu0 %300 }
 0x60a   :  { %5213 = vrcp.f32 %v1003_v45  ;;  %4771 = vmatpush3.msra.mxu1 %v301_v46 }
 0x60b   :  { %4775 = vmatprep.subr.mxu1 %v5288_v15 }
 0x60d   :  { %v309_v3 = vpop.permute.xlu1 %308 }
 0x610   :  { %v5212_v48 = vpop.eup %5211 }
 0x611   :  { %v1026_v49 = vmul.f32 %v5212_v48, %v5196_v8  ;;  %v1616_v8 = vld [vmem:[%s6353_s1 + $0xc0] sm:$0xff] }
 0x613   :  { %4773 = vmatmul.mubr.msk.f32.vlgmr.msra.gmra.mrb[24].mxu1 %vm943_vm4, %v1026_v49 }
 0x614   :  { %v5214_v50 = vpop.eup %5213  ;;  %4776 = vmatpush3.msra.mxu1 %v303_v41  ;;  %4777 = vmatprep.mubr.msk.f32.mxu1 %vm5289_vm1, %v5288_v15 }
 0x615   :  { %v1027_v52 = vmul.f32 %v5214_v50, %v5607_v10  ;;  %4785 = vmatprep.subr.mxu1 %v5288_v15  ;;  %v5011_v10 = vpack.c.bf16 %v1617_v9, %v1616_v8  ;;  %v1997_v8 = vld [vmem:[%s6357_s3 + $0x40] sm:$0xff]  ;;  %v1999_v9 = vld [vmem:[%s6357_s3 + $0x50] sm:$0xff] }
 0x617   :  { %4778 = vmatmul.mubr.msk.f32.vlgmr.msra.gmra.mrb[26].mxu1 %vm943_vm4, %v1027_v52 }
 0x618   :  { %4786 = vmatpush3.msra.mxu1 %v309_v3  ;;  %4787 = vmatprep.mubr.msk.f32.mxu1 %vm5289_vm1, %v5288_v15 }
 0x619   :  { %4795 = vmatprep.subr.mxu1 %v5288_v15 }
 0x63a   :  { %v1006_v51 = vpop.xlane.xlu0 %1005 }
 0x63b   :  { %5215 = vrcp.f32 %v1006_v51 }
 0x63e   :  { %v1009_v53 = vpop.xlane.xlu1 %1008  ;;  %v307_v54 = vpop.permute.xlu0 %306 }
 0x63f   :  { %5217 = vrcp.f32 %v1009_v53  ;;  %4781 = vmatpush3.msra.mxu0 %v307_v54 }
 0x640   :  { %4790 = vmatprep.subr.mxu0 %v5288_v15 }
 0x642   :  { %v1012_v55 = vpop.xlane.xlu1 %1011  ;;  %v313_v59 = vpop.permute.xlu0 %312 }
 0x643   :  { %5219 = vrcp.f32 %v1012_v55  ;;  %v1990_v55 = vld [vmem:[%s6357_s3 + $0x8] sm:$0xff] }
 0x645   :  { %v5216_v56 = vpop.eup %5215 }
 0x646   :  { %v1028_v57 = vmul.f32 %v5216_v56, %v5202_v29  ;;  %v1015_v58 = vpop.xlane.xlu1 %1014  ;;  %v1992_v56 = vld [vmem:[%s6357_s3 + $0x18] sm:$0xff] }
 0x647   :  { %5221 = vrcp.f32 %v1015_v58  ;;  %v1989_v58 = vld [vmem:[%s6357_s3] sm:$0xff] }
 0x648   :  { %4783 = vmatmul.mubr.msk.f32.vlgmr.msra.gmra.mrb[4].mxu0 %vm943_vm4, %v1028_v57  ;;  %v5023_v57 = vpack.c.bf16 %v1992_v56, %v1990_v55 }
 0x649   :  { %v5218_v60 = vpop.eup %5217  ;;  %4791 = vmatpush3.msra.mxu0 %v313_v59  ;;  %4792 = vmatprep.mubr.msk.f32.mxu0 %vm5289_vm1, %v5288_v15  ;;  %v1991_v59 = vld [vmem:[%s6357_s3 + $0x10] sm:$0xff] }
 0x64a   :  { %v1029_v61 = vmul.f32 %v5218_v60, %v5204_v31  ;;  %v315_v62 = vpop.permute.xlu1 %314  ;;  %5008 = vmatprep.subr.bf16.mxu0 %v5007_v7  ;;  %v5025_v60 = vpack.c.bf16 %v1991_v59, %v1989_v58  ;;  %v2144_v58 = vld [vmem:[%s6353_s1 + $0x1b8] sm:$0xff] }
 0x64c   :  { %4788 = vmatmul.mubr.msk.f32.vlgmr.msra.gmra.mrb[28].mxu1 %vm943_vm4, %v1029_v61  ;;  %v1994_v61 = vld [vmem:[%s6357_s3 + $0x28] sm:$0xff] }
 0x64d   :  { %v5220_v63 = vpop.eup %5219  ;;  %4796 = vmatpush3.msra.mxu1 %v315_v62  ;;  %4797 = vmatprep.mubr.msk.f32.mxu1 %vm5289_vm1, %v5288_v15  ;;  %v1996_v62 = vld [vmem:[%s6357_s3 + $0x38] sm:$0xff] }
 0x64e   :  { %v1030_v0 = vmul.f32 %v5220_v63, %v5206_v32  ;;  %5024 = vmatprep.subr.bf16.mxu1 %v5023_v57  ;;  %v5027_v63 = vpack.c.bf16 %v1996_v62, %v1994_v61  ;;  %v2145_v62 = vld [vmem:[%s6353_s1 + $0x1c0] sm:$0xff] }
 0x650   :  { %4793 = vmatmul.mubr.msk.f32.vlgmr.msra.gmra.mrb[6].mxu0 %vm943_vm4, %v1030_v0  ;;  %v1993_v0 = vld [vmem:[%s6357_s3 + $0x20] sm:$0xff] }
 0x651   :  { %v5222_v1 = vpop.eup %5221  ;;  %5010 = vmatpush3.bf16.msra.mxu0 %v5007_v7  ;;  %v5031_v7 = vpack.c.bf16 %v2000_v5, %v1998_v4  ;;  %v2147_v5 = vld [vmem:[%s6353_s1 + $0x1d0] sm:$0xff] }
 0x652   :  { %v1031_v2 = vmul.f32 %v5222_v1, %v5210_v37  ;;  %5012 = vmatprep.subr.bf16.mxu0 %v5011_v10  ;;  %v1995_v1 = vld [vmem:[%s6357_s3 + $0x30] sm:$0xff] }
 0x654   :  { %4798 = vmatmul.mubr.msk.f32.vlgmr.msra.gmra.mrb[30].mxu1 %vm943_vm4, %v1031_v2  ;;  %v5029_v2 = vpack.c.bf16 %v1995_v1, %v1993_v0  ;;  %v2129_v1 = vld [vmem:[%s6353_s1 + $0x140] sm:$0xff] }
 0x655   :  { %2088 = vmatprep.mubr.f32.mxu1 %v5288_v15  ;;  %5026 = vmatpush1.bf16.msra.mxu1 %v5025_v60  ;;  %v2128_v60 = vld [vmem:[%s6353_s1 + $0x138] sm:$0xff] }
 0x656   :  { %5028 = vmatprep.subr.bf16.mxu1 %v5027_v63  ;;  %v2146_v63 = vld [vmem:[%s6353_s1 + $0x1c8] sm:$0xff] }
 0x657   :  { %v5055_v0 = vpack.c.bf16 %v2146_v63, %v2145_v62 }
 0x659   :  { %5030 = vmatpush1.bf16.msra.mxu1 %v5029_v2  ;;  %v2130_v2 = vld [vmem:[%s6353_s1 + $0x148] sm:$0xff] }
 0x65a   :  { %5032 = vmatprep.subr.bf16.mxu1 %v5031_v7  ;;  %v5057_v4 = vpack.c.bf16 %v2130_v2, %v2129_v1  ;;  %v2148_v7 = vld [vmem:[%s6353_s1 + $0x1d8] sm:$0xff] }
 0x67b   :  { %v1101_v11 = vpop.f32.mrb[20].mxu1 }
 0x67c   :  { %v4764_v12 = vpop.f32.mrb[21].mxu1 }
 0x67d   :  { %v2004_v12 = vld [vmem:[%s6357_s3 + $0x78] sm:$0xff] }
 0x687   :  { %v1174_v13 = vpop.f32.mrb[22].mxu1 }
 0x688   :  { %v4769_v14 = vpop.f32.mrb[23].mxu1 }
 0x6e6   :  { %v1247_v16 = vpop.f32.mrb[24].mxu1 }
 0x6e7   :  { %v4774_v19 = vpop.f32.mrb[25].mxu1  ;;  %4804 = vmatprep.mubr.msk.f32.mxu0 %vm320_vm2, %v1247_v16  ;;  %v2003_v16 = vld [vmem:[%s6357_s3 + $0x70] sm:$0xff] }
 0x6e8   :  { %v2138_v19 = vld [vmem:[%s6353_s1 + $0x188] sm:$0xff] }
 0x6ea   :  { %v1320_v21 = vpop.f32.mrb[26].mxu1 }
 0x6eb   :  { %v4779_v22 = vpop.f32.mrb[27].mxu1  ;;  %4805 = vmatmul.mubr.msk.f32.vlgmr.msra.gmra.mrb[8].mxu0 %vm320_vm2, %v1320_v21  ;;  %v5039_v21 = vpack.c.bf16 %v2138_v19, %v2137_v18  ;;  %v2151_v19 = vld [vmem:[%s6353_s1 + $0x1f0] sm:$0xff] }
 0x6ec   :  { %4811 = vmatprep.mubr.msk.f32.mxu0 %vm320_vm2, %v1101_v11  ;;  %5014 = vmatpush3.bf16.msra.mxu0 %v5011_v10  ;;  %v5033_v10 = vpack.c.bf16 %v1999_v9, %v1997_v8  ;;  %v2002_v11 = vld [vmem:[%s6357_s3 + $0x68] sm:$0xff]  ;;  %v5059_v8 = vpack.c.bf16 %v2148_v7, %v2147_v5  ;;  %v2131_v9 = vld [vmem:[%s6353_s1 + $0x150] sm:$0xff] }
 0x6ed   :  { %5016 = vmatprep.subr.bf16.mxu0 %v5015_v20  ;;  %v5035_v14 = vpack.c.bf16 %v2004_v12, %v2002_v11  ;;  %v2122_v22 = vld [vmem:[%s6353_s1 + $0x108] sm:$0xff]  ;;  %v2149_v12 = vld [vmem:[%s6353_s1 + $0x1e0] sm:$0xff] }
 0x6ee   :  { %5034 = vmatpush1.bf16.msra.mxu1 %v5033_v10  ;;  %v2132_v10 = vld [vmem:[%s6353_s1 + $0x158] sm:$0xff] }
 0x6ef   :  { %5036 = vmatprep.subr.bf16.mxu1 %v5035_v14  ;;  %v5061_v11 = vpack.c.bf16 %v2132_v10, %v2131_v9 }
 0x6f3   :  { %4812 = vmatmul.mubr.msk.f32.vlgmr.msra.gmra.mrb[8].mxu0 %vm320_vm2, %v1174_v13  ;;  %v2001_v13 = vld [vmem:[%s6357_s3 + $0x60] sm:$0xff] }
 0x6f4   :  { %5018 = vmatpush3.bf16.msra.mxu0 %v5015_v20  ;;  %v5037_v17 = vpack.c.bf16 %v2003_v16, %v2001_v13  ;;  %v2121_v20 = vld [vmem:[%s6353_s1 + $0x100] sm:$0xff]  ;;  %v2150_v13 = vld [vmem:[%s6353_s1 + $0x1e8] sm:$0xff] }
 0x6f5   :  { %5020 = vmatprep.subr.bf16.mxu0 %v5019_v25  ;;  %v5063_v14 = vpack.c.bf16 %v2150_v13, %v2149_v12  ;;  %v2133_v16 = vld [vmem:[%s6353_s1 + $0x160] sm:$0xff] }
 0x6f6   :  { %5038 = vmatpush1.bf16.msra.mxu1 %v5037_v17  ;;  %v2134_v17 = vld [vmem:[%s6353_s1 + $0x168] sm:$0xff] }
 0x6f7   :  { %v5065_v18 = vpack.c.bf16 %v2134_v17, %v2133_v16 }
 0x71b   :  { %v1393_v26 = vpop.f32.mrb[4].mxu0 }
 0x71c   :  { %v4784_v27 = vpop.f32.mrb[5].mxu0  ;;  %4818 = vmatprep.mubr.msk.f32.mxu0 %vm320_vm2, %v1393_v26  ;;  %v5043_v26 = vpack.c.bf16 %v2140_v24, %v2139_v23  ;;  %v2136_v23 = vld [vmem:[%s6353_s1 + $0x178] sm:$0xff] }
 0x71d   :  { %v2123_v27 = vld [vmem:[%s6353_s1 + $0x110] sm:$0xff] }
 0x71f   :  { %v1466_v28 = vpop.f32.mrb[28].mxu1 }
 0x720   :  { %v4789_v29 = vpop.f32.mrb[29].mxu1  ;;  %4819 = vmatmul.mubr.msk.f32.vlgmr.msra.gmra.mrb[8].mxu0 %vm320_vm2, %v1466_v28  ;;  %v2124_v28 = vld [vmem:[%s6353_s1 + $0x118] sm:$0xff] }
 0x721   :  { %5022 = vmatpush3.bf16.msra.mxu0 %v5019_v25  ;;  %v5041_v25 = vpack.c.bf16 %v2122_v22, %v2121_v20  ;;  %v2141_v29 = vld [vmem:[%s6353_s1 + $0x1a0] sm:$0xff]  ;;  %v2152_v20 = vld [vmem:[%s6353_s1 + $0x1f8] sm:$0xff]  ;;  %v2135_v22 = vld [vmem:[%s6353_s1 + $0x170] sm:$0xff] }
 0x722   :  { %5040 = vmatprep.subr.bf16.mxu0 %v5039_v21  ;;  %v5067_v21 = vpack.c.bf16 %v2152_v20, %v2151_v19  ;;  %v5069_v24 = vpack.c.bf16 %v2136_v23, %v2135_v22  ;;  %v2274_v20 = vld [vmem:[%s6356_s2 + $0x88] sm:$0xff]  ;;  %v2273_v23 = vld [vmem:[%s6356_s2 + $0x80] sm:$0xff] }
 0x723   :  { %v1539_v30 = vpop.f32.mrb[6].mxu0 }
 0x724   :  { %v4794_v31 = vpop.f32.mrb[7].mxu0  ;;  %4825 = vmatprep.mubr.msk.f32.mxu0 %vm320_vm2, %v1539_v30  ;;  %v2142_v30 = vld [vmem:[%s6353_s1 + $0x1a8] sm:$0xff] }
 0x725   :  { %v5045_v31 = vpack.c.bf16 %v2124_v28, %v2123_v27 }
 0x727   :  { %v1612_v32 = vpop.f32.mrb[30].mxu1 }
 0x728   :  { %v4799_v33 = vpop.f32.mrb[31].mxu1  ;;  %4826 = vmatmul.mubr.msk.f32.vlgmr.msra.gmra.mrb[8].mxu0 %vm320_vm2, %v1612_v32  ;;  %v5047_v32 = vpack.c.bf16 %v2142_v30, %v2141_v29 }
 0x729   :  { %5042 = vmatpush3.bf16.msra.mxu0 %v5041_v25  ;;  %v2125_v33 = vld [vmem:[%s6353_s1 + $0x120] sm:$0xff]  ;;  %v4495_v25 = vld [vmem:[%s6355_s4 + $0x16] ss:$8 sm:$0x3] }
 0x72a   :  { %5044 = vmatprep.subr.bf16.mxu0 %v5043_v26  ;;  %v2011_v26 = vrot.slane %v4495_v25, %v5502_v39  ;;  %v2015_v27 = vrot.slane %v4495_v25, %v5513_v44 }
 0x72d   :  { %5046 = vmatpush3.bf16.msra.mxu0 %v5045_v31 }
 0x72e   :  { %5048 = vmatprep.subr.bf16.mxu0 %v5047_v32 }
 0x7fb   :  { %v4827_v34 = vpop.f32.mrb[8].mxu0 }
 0x7fc   :  { %v1953_v36 = vadd.f32 %v4827_v34, %v5430_v47  ;;  %v1941_v37 = vpop.f32.mrb[9].mxu0  ;;  %v2126_v34 = vld [vmem:[%s6353_s1 + $0x128] sm:$0xff] }
 0x7fd   :  { %v1952_v40 = vadd.f32 %v1941_v37, %v5426_v43 }
 0x7fe   :  { %v5690_v41 = vadd.f32 %v1954_v35, %v1953_v36 }
 0x7ff   :  { %v5692_v42 = vadd.f32 %v1954_v35, %v1952_v40  ;;  %v5049_v35 = vpack.c.bf16 %v2126_v34, %v2125_v33 }
 0x800   :  { %v1962_v45 = vsel %vm48_vm0, %v5690_v41, 0.0 }
 0x801   :  { %1963 = vadd.xlane.f32.xlu1 %v1962_v45  ;;  %v1959_v46 = vsel %vm48_vm0, %v5692_v42, 0.0  ;;  %5050 = vmatpush3.bf16.msra.mxu0 %v5049_v35 }
 0x802   :  { %1960 = vadd.xlane.f32.xlu0 %v1959_v46 }
 0x88e   :  { %v1964_v48 = vpop.xlane.xlu1 %1963 }
 0x88f   :  { %v1966_v49 = vmul.f32 0.015625, %v1964_v48  ;;  %v1961_v50 = vpop.xlane.xlu0 %1960 }
 0x890   :  { %v1965_v52 = vmul.f32 0.015625, %v1961_v50  ;;  %v1957_v50 = vld [vmem:[%s6355_s4 + $0x14] ss:$0 sm:$0xff] }
 0x891   :  { %v5699_v47 = vsub.f32 %v5690_v41, %v1966_v49 }
 0x892   :  { %v5702_v43 = vsub.f32 %v5692_v42, %v1965_v52 }
 0x893   :  { %v1970_v53 = vmul.f32 %v5699_v47, %v5699_v47 }
 0x894   :  { %v1969_v3 = vmul.f32 %v5702_v43, %v5702_v43 }
 0x895   :  { %v1974_v54 = vsel %vm48_vm0, %v1970_v53, 0.0 }
 0x896   :  { %v1971_v51 = vsel %vm48_vm0, %v1969_v3, 0.0  ;;  %v1958_v3 = vld [vmem:[%s6355_s4 + $0x15] ss:$0 sm:$0xff] }
 0x897   :  { %1972 = vadd.xlane.f32.xlu0 %v1971_v51 }
 0x89b   :  { %1975 = vadd.xlane.f32.xlu0 %v1974_v54 }
 0x924   :  { %v1973_v36 = vpop.xlane.xlu0 %1972 }
 0x925   :  { %v1977_v37 = vmul.f32 0.015625, %v1973_v36 }
 0x927   :  { %v1979_v40 = vadd.f32 1e-06, %v1977_v37 }
 0x928   :  { %v1976_v45 = vpop.xlane.xlu0 %1975 }
 0x929   :  { %5223 = vrsqrt.f32 %v1979_v40  ;;  %v1978_v46 = vmul.f32 0.015625, %v1976_v45 }
 0x92b   :  { %v1980_v48 = vadd.f32 1e-06, %v1978_v46 }
 0x92d   :  { %5225 = vrsqrt.f32 %v1980_v48 }
 0x933   :  { %v5224_v49 = vpop.eup %5223 }
 0x934   :  { %v1983_v52 = vmul.f32 %v5224_v49, %v5702_v43  ;;  %v2143_v43 = vld [vmem:[%s6353_s1 + $0x1b0] sm:$0xff] }
 0x935   :  { %v5051_v59 = vpack.c.bf16 %v2144_v58, %v2143_v43 }
 0x936   :  { %v1985_v51 = vmul.f32 %v1983_v52, %v1957_v50 }
 0x937   :  { %v5226_v53 = vpop.eup %5225  ;;  %5052 = vmatprep.subr.bf16.mxu0 %v5051_v59 }
 0x938   :  { %v1987_v54 = vadd.f32 %v1985_v51, %v1958_v3  ;;  %v1984_v55 = vmul.f32 %v5226_v53, %v5699_v47  ;;  %v2127_v47 = vld [vmem:[%s6353_s1 + $0x130] sm:$0xff] }
 0x939   :  { %v5053_v61 = vpack.c.bf16 %v2128_v60, %v2127_v47 }
 0x93a   :  { %4496 = vmatmul.mubr.msk.f32.vlgmr.msra.gmra.mrb[32].mxu1 %vm48_vm0, %v1987_v54  ;;  %v1986_v56 = vmul.f32 %v1984_v55, %v1957_v50 }
 0x93b   :  { %2094 = vmatprep.mubr.f32.mxu1 %v5288_v15  ;;  %5054 = vmatpush3.bf16.msra.mxu0 %v5053_v61  ;;  %v2153_v61 = vld [vmem:[%s6355_s4 + $0x17] ss:$0 sm:$0xff] }
 0x93c   :  { %v1988_v57 = vadd.f32 %v1986_v56, %v1958_v3  ;;  %5056 = vmatprep.subr.bf16.mxu0 %v5055_v0 }
 0x93e   :  { %4497 = vmatmul.mubr.msk.f32.gmra.mrb[34].mxu1 %vm48_vm0, %v1988_v57 }
 0x93f   :  { %2372 = vmatprep.mubr.f32.mxu1 %v5288_v15  ;;  %5058 = vmatpush3.bf16.msra.mxu0 %v5057_v4 }
 0x940   :  { %5060 = vmatprep.subr.bf16.mxu0 %v5059_v8 }
 0x943   :  { %5062 = vmatpush3.bf16.msra.mxu0 %v5061_v11 }
 0x944   :  { %5064 = vmatprep.subr.bf16.mxu0 %v5063_v14 }
 0x947   :  { %5066 = vmatpush3.bf16.msra.mxu0 %v5065_v18 }
 0x948   :  { %5068 = vmatprep.subr.bf16.mxu0 %v5067_v21  ;;  %v2276_v21 = vld [vmem:[%s6356_s2 + $0x98] sm:$0xff] }
 0x949   :  { %v5071_v22 = vpack.c.bf16 %v2276_v21, %v2274_v20 }
 0x94b   :  { %5070 = vmatpush3.bf16.msra.mxu0 %v5069_v24  ;;  %v2275_v24 = vld [vmem:[%s6356_s2 + $0x90] sm:$0xff]  ;;  %5072 = vmatprep.subr.bf16.mxu1 %v5071_v22 }
 0x94c   :  { %4848 = vmatprep.subr.mxu0 %v5288_v15  ;;  %v5073_v25 = vpack.c.bf16 %v2275_v24, %v2273_v23 }
 0x94e   :  { %5074 = vmatpush1.bf16.msra.mxu1 %v5073_v25 }
 0xa0d   :  { %v2090_v28 = vpop.f32.mrb[32].mxu1 }
 0xa0e   :  { %v2091_v29 = vadd.f32 %v2090_v28, %v2011_v26  ;;  %v2092_v30 = vpop.f32.mrb[33].mxu1 }
 0xa0f   :  { %v2093_v31 = vadd.f32 %v2092_v30, %v2015_v27  ;;  %v2279_v30 = vld [vmem:[%s6356_s2 + $0xb0] sm:$0xff] }
 0xa10   :  { %v2105_v32 = vmul.f32 0.70710677, %v2091_v29  ;;  %v2101_v3 = vmul.f32 0.5, %v2091_v29  ;;  %v2277_v29 = vld [vmem:[%s6356_s2 + $0xa0] sm:$0xff] }
 0xa11   :  { %v2106_v33 = vmul.f32 0.70710677, %v2093_v31  ;;  %v2096_v34 = vpop.f32.mrb[34].mxu1  ;;  %v2102_v50 = vmul.f32 0.5, %v2093_v31  ;;  %v5077_v31 = vpack.c.bf16 %v2279_v30, %v2277_v29 }
 0xa12   :  { %5227 = verf.f32 %v2105_v32  ;;  %v2097_v35 = vadd.f32 %v2096_v34, %v2011_v26  ;;  %v2098_v36 = vpop.f32.mrb[35].mxu1  ;;  %v2278_v26 = vld [vmem:[%s6356_s2 + $0xa8] sm:$0xff]  ;;  %v2281_v34 = vld [vmem:[%s6356_s2 + $0xc0] sm:$0xff] }
 0xa13   :  { %5229 = verf.f32 %v2106_v33  ;;  %v2099_v37 = vadd.f32 %v2098_v36, %v2015_v27  ;;  %v2280_v27 = vld [vmem:[%s6356_s2 + $0xb8] sm:$0xff]  ;;  %v2282_v32 = vld [vmem:[%s6356_s2 + $0xc8] sm:$0xff]  ;;  %v2283_v36 = vld [vmem:[%s6356_s2 + $0xd0] sm:$0xff] }
 0xa14   :  { %v2107_v40 = vmul.f32 0.70710677, %v2097_v35  ;;  %v2103_v58 = vmul.f32 0.5, %v2097_v35  ;;  %v5075_v28 = vpack.c.bf16 %v2280_v27, %v2278_v26  ;;  %v2284_v33 = vld [vmem:[%s6356_s2 + $0xd8] sm:$0xff] }
 0xa15   :  { %v2108_v45 = vmul.f32 0.70710677, %v2099_v37  ;;  %v2104_v57 = vmul.f32 0.5, %v2099_v37  ;;  %v5079_v35 = vpack.c.bf16 %v2284_v33, %v2282_v32  ;;  %v2286_v37 = vld [vmem:[%s6356_s2 + $0xe8] sm:$0xff] }
 0xa16   :  { %5231 = verf.f32 %v2107_v40  ;;  %5076 = vmatprep.subr.bf16.mxu1 %v5075_v28  ;;  %v2288_v40 = vld [vmem:[%s6356_s2 + $0xf8] sm:$0xff] }
 0xa17   :  { %5233 = verf.f32 %v2108_v45  ;;  %5078 = vmatpush1.bf16.msra.mxu1 %v5077_v31  ;;  %v5081_v45 = vpack.c.bf16 %v2283_v36, %v2281_v34 }
 0xa18   :  { %5080 = vmatprep.subr.bf16.mxu1 %v5079_v35 }
 0xa1b   :  { %5082 = vmatpush1.bf16.msra.mxu1 %v5081_v45 }
 0xa1c   :  { %v5228_v46 = vpop.eup %5227 }
 0xa1d   :  { %v5230_v48 = vpop.eup %5229  ;;  %v2113_v49 = vadd.f32 1.0, %v5228_v46  ;;  %v5083_v46 = vpack.c.bf16 %v2288_v40, %v2286_v37 }
 0xa1e   :  { %v2114_v52 = vadd.f32 1.0, %v5230_v48  ;;  %v2285_v48 = vld [vmem:[%s6356_s2 + $0xe0] sm:$0xff] }
 0xa1f   :  { %v2117_v55 = vmul.f32 %v2113_v49, %v2101_v3  ;;  %v2287_v49 = vld [vmem:[%s6356_s2 + $0xf0] sm:$0xff]  ;;  %5084 = vmatprep.subr.bf16.mxu1 %v5083_v46 }
 0xa20   :  { %v5232_v51 = vpop.eup %5231  ;;  %v2118_v53 = vmul.f32 %v2114_v52, %v2102_v50  ;;  %v5085_v50 = vpack.c.bf16 %v2287_v49, %v2285_v48 }
 0xa21   :  { %v5234_v54 = vpop.eup %5233  ;;  %v2115_v56 = vadd.f32 1.0, %v5232_v51 }
 0xa22   :  { %v2116_v43 = vadd.f32 1.0, %v5234_v54  ;;  %2218 = vmatprep.mubr.f32.mxu0 %v2118_v53  ;;  %5086 = vmatpush1.bf16.msra.mxu1 %v5085_v50 }
 0xa23   :  { %2219 = vmatmul.mubr.f32.vlgmr.msra.gmra.mrb[10].mxu0 %v2117_v55  ;;  %v2119_v47 = vmul.f32 %v2115_v56, %v2103_v58  ;;  %4828 = vmatprep.subr.mxu1 %v5288_v15 }
 0xa24   :  { %v2120_v59 = vmul.f32 %v2116_v43, %v2104_v57  ;;  %v2231_v57 = vld [vmem:[%s6355_s4 + $0x20] ss:$0 sm:$0xff] }
 0xa26   :  { %2223 = vmatprep.mubr.f32.mxu0 %v2120_v59 }
 0xa27   :  { %2224 = vmatmul.mubr.f32.gmra.mrb[12].mxu0 %v2119_v47  ;;  %v2232_v47 = vld [vmem:[%s6355_s4 + $0x21] ss:$0 sm:$0xff] }
 0xa28   :  { %4850 = vmatprep.mubr.msk.f32.mxu0 %vm5289_vm1, %v5288_v15 }
 0xaf6   :  { %v4618_v60 = vpop.f32.mrb[10].mxu0 }
 0xaf7   :  { %v4619_v62 = vpop.f32.mrb[11].mxu0 }
 0xaf8   :  { %v4620_v63 = vadd.f32 %v4619_v62, %v4618_v60 }
 0xafa   :  { %v2221_v0 = vadd.f32 %v4620_v63, %v2153_v61  ;;  %v4621_v1 = vpop.f32.mrb[12].mxu0 }
 0xafb   :  { %v4622_v2 = vpop.f32.mrb[13].mxu0 }
 0xafc   :  { %v5878_v4 = vadd.f32 %v2221_v0, %v5692_v42  ;;  %v4623_v5 = vadd.f32 %v4622_v2, %v4621_v1 }
 0xafe   :  { %v2226_v7 = vadd.f32 %v4623_v5, %v2153_v61  ;;  %v2233_v8 = vsel %vm48_vm0, %v5878_v4, 0.0 }
 0xaff   :  { %2234 = vadd.xlane.f32.xlu0 %v2233_v8 }
 0xb00   :  { %v5883_v9 = vadd.f32 %v2226_v7, %v5690_v41 }
 0xb02   :  { %v2236_v10 = vsel %vm48_vm0, %v5883_v9, 0.0 }
 0xb03   :  { %2237 = vadd.xlane.f32.xlu1 %v2236_v10 }
 0xb8c   :  { %v2235_v11 = vpop.xlane.xlu0 %2234 }
 0xb8d   :  { %v2239_v12 = vmul.f32 0.015625, %v2235_v11 }
 0xb8f   :  { %v2241_v13 = vsub.f32 %v5878_v4, %v2239_v12 }
 0xb90   :  { %v2238_v14 = vpop.xlane.xlu1 %2237 }
 0xb91   :  { %v2240_v42 = vmul.f32 0.015625, %v2238_v14  ;;  %v2243_v16 = vmul.f32 %v2241_v13, %v2241_v13 }
 0xb93   :  { %v2242_v17 = vsub.f32 %v5883_v9, %v2240_v42  ;;  %v2245_v18 = vsel %vm48_vm0, %v2243_v16, 0.0 }
 0xb94   :  { %2246 = vadd.xlane.f32.xlu0 %v2245_v18 }
 0xb95   :  { %v2244_v19 = vmul.f32 %v2242_v17, %v2242_v17 }
 0xb97   :  { %v2248_v41 = vsel %vm48_vm0, %v2244_v19, 0.0 }
 0xb98   :  { %2249 = vadd.xlane.f32.xlu1 %v2248_v41 }
 0xc21   :  { %v2247_v52 = vpop.xlane.xlu0 %2246 }
 0xc22   :  { %v2251_v3 = vmul.f32 0.015625, %v2247_v52 }
 0xc24   :  { %v2253_v51 = vadd.f32 1e-06, %v2251_v3 }
 0xc25   :  { %v2250_v53 = vpop.xlane.xlu1 %2249 }
 0xc26   :  { %5235 = vrsqrt.f32 %v2253_v51  ;;  %v2252_v54 = vmul.f32 0.015625, %v2250_v53 }
 0xc28   :  { %v2254_v55 = vadd.f32 1e-06, %v2252_v54 }
 0xc2a   :  { %5237 = vrsqrt.f32 %v2254_v55 }
 0xc30   :  { %v5236_v56 = vpop.eup %5235 }
 0xc31   :  { %v2257_v43 = vmul.f32 %v5236_v56, %v2241_v13  ;;  %v4498_v13 = vld [vmem:[%s6355_s4 + $0x22] ss:$8 sm:$0x3] }
 0xc32   :  { %v2295_v14 = vrot.slane %v4498_v13, %v5502_v39  ;;  %v2299_v30 = vrot.slane %v4498_v13, %v5513_v44 }
 0xc33   :  { %v2259_v58 = vmul.f32 %v2257_v43, %v2231_v57 }
 0xc34   :  { %v5238_v59 = vpop.eup %5237 }
 0xc35   :  { %v2258_v60 = vmul.f32 %v5238_v59, %v2242_v17  ;;  %v2261_v62 = vadd.f32 %v2259_v58, %v2232_v47 }
 0xc37   :  { %v2260_v61 = vmul.f32 %v2258_v60, %v2231_v57  ;;  %v2263_v0 = vsel %vm48_vm0, %v2261_v62, 0.0 }
 0xc39   :  { %v2262_v63 = vadd.f32 %v2260_v61, %v2232_v47 }
 0xc3b   :  { %v2264_v1 = vsel %vm48_vm0, %v2262_v63, 0.0 }
 0xc3c   :  { %v2265_v2 = vadd.f32 %v2264_v1, %v2263_v0 }
 0xc3e   :  { %v2267_v5 = vadd.f32 %v2265_v2, %v2261_v62  ;;  %v2268_v7 = vadd.f32 %v2265_v2, %v2262_v63 }
 0xc40   :  { %v2269_v8 = vmul.f32 0.33333334, %v2267_v5  ;;  %v2270_v11 = vmul.f32 0.33333334, %v2268_v7 }
 0xc42   :  { %v2271_v10 = vsel %vm2266_vm5, %v2261_v62, %v2269_v8  ;;  %v2272_v12 = vsel %vm2266_vm5, %v2262_v63, %v2270_v11 }
 0xc43   :  { %4499 = vmatmul.mubr.msk.f32.vlgmr.msra.gmra.mrb[36].mxu1 %vm48_vm0, %v2271_v10 }
 0xc44   :  { %2378 = vmatprep.mubr.f32.mxu1 %v5288_v15 }
 0xc47   :  { %4500 = vmatmul.mubr.msk.f32.gmra.mrb[38].mxu1 %vm48_vm0, %v2272_v12 }
 0xc48   :  { %4830 = vmatprep.mubr.msk.f32.mxu1 %vm5289_vm1, %v5288_v15 }
 0xd16   :  { %v2374_v38 = vpop.f32.mrb[36].mxu1 }
 0xd17   :  { %v2375_v42 = vadd.f32 %v2374_v38, %v2295_v14  ;;  %v2376_v16 = vpop.f32.mrb[37].mxu1 }
 0xd18   :  { %v6001_v33 = vadd.f32 %v2376_v16, %v2299_v30 }
 0xd19   :  { %2387 = vrot.lane.b32.xlu0 %v2375_v42, %s5290_s12 }
 0xd1a   :  { %v2380_v17 = vpop.f32.mrb[38].mxu1 }
 0xd1b   :  { %v2381_v18 = vadd.f32 %v2380_v17, %v2295_v14  ;;  %v2382_v19 = vpop.f32.mrb[39].mxu1 }
 0xd1c   :  { %v6011_v35 = vadd.f32 %v2382_v19, %v2299_v30 }
 0xd1d   :  { %2389 = vrot.lane.b32.xlu1 %v2381_v18, %s5290_s12  ;;  %2395 = vrot.lane.b32.xlu0 %v2375_v42, %s5291_s13 }
 0xd21   :  { %2391 = vrot.lane.b32.xlu1 %v2375_v42, %s5293_s15  ;;  %2419 = vrot.lane.b32.xlu0 %v2375_v42, %s5292_s14 }
 0xd25   :  { %2393 = vrot.lane.b32.xlu1 %v2381_v18, %s5293_s15 }
 0xd29   :  { %2397 = vrot.lane.b32.xlu1 %v2381_v18, %s5291_s13 }
 0xd2d   :  { %2495 = vrot.lane.b32.xlu1 %v2381_v18, %s5292_s14 }
 0xd8b   :  { %v2388_v41 = vpop.permute.xlu0 %2387 }
 0xd8c   :  { %2571 = vrot.lane.b32.xlu0 %v2388_v41, %s5292_s14 }
 0xd8f   :  { %v2390_v20 = vpop.permute.xlu1 %2389  ;;  %v2396_v21 = vpop.permute.xlu0 %2395 }
 0xd90   :  { %2647 = vrot.lane.b32.xlu1 %v2390_v20, %s5292_s14 }
 0xd93   :  { %v2392_v22 = vpop.permute.xlu1 %2391  ;;  %v2420_v23 = vpop.permute.xlu0 %2419 }
 0xd94   :  { %2723 = vrot.lane.b32.xlu0 %v2392_v22, %s5292_s14  ;;  %4829 = vmatpush3.xpose.msk.msra.mxu1 %vm320_vm2, %v2420_v23 }
 0xd95   :  { %4833 = vmatprep.subr.mxu1 %v5288_v15 }
 0xd97   :  { %v2394_v24 = vpop.permute.xlu1 %2393  ;;  %4831 = vmatmul.mubr.msk.f32.vlgmr.msra.gmra.mrb[40].mxu1 %vm320_vm2, %v2375_v42 }
 0xd98   :  { %2799 = vrot.lane.b32.xlu1 %v2394_v24, %s5292_s14  ;;  %2875 = vrot.lane.b32.xlu0 %v2396_v21, %s5292_s14 }
 0xd99   :  { %4835 = vmatprep.mubr.msk.f32.mxu1 %vm5289_vm1, %v5288_v15 }
 0xd9b   :  { %v2398_v25 = vpop.permute.xlu1 %2397 }
 0xd9c   :  { %2951 = vrot.lane.b32.xlu1 %v2398_v25, %s5292_s14 }
 0xd9f   :  { %v2496_v26 = vpop.permute.xlu1 %2495 }
 0xda0   :  { %4834 = vmatpush3.xpose.msk.msra.mxu1 %vm320_vm2, %v2496_v26 }
 0xda1   :  { %4838 = vmatprep.subr.mxu1 %v5288_v15 }
 0xda3   :  { %4836 = vmatmul.mubr.msk.f32.vlgmr.msra.gmra.mrb[42].mxu1 %vm320_vm2, %v2381_v18 }
 0xda4   :  { %4840 = vmatprep.mubr.msk.f32.mxu1 %vm5289_vm1, %v5288_v15 }
 0xdfe   :  { %v2572_v27 = vpop.permute.xlu0 %2571 }
 0xdff   :  { %4839 = vmatpush3.xpose.msk.msra.mxu1 %vm320_vm2, %v2572_v27 }
 0xe00   :  { %4843 = vmatprep.subr.mxu1 %v5288_v15 }
 0xe02   :  { %v2648_v28 = vpop.permute.xlu1 %2647  ;;  %4841 = vmatmul.mubr.msk.f32.vlgmr.msra.gmra.mrb[44].mxu1 %vm320_vm2, %v2388_v41 }
 0xe03   :  { %4844 = vmatpush3.xpose.msk.msra.mxu1 %vm320_vm2, %v2648_v28  ;;  %4845 = vmatprep.mubr.msk.f32.mxu1 %vm5289_vm1, %v5288_v15 }
 0xe04   :  { %4853 = vmatprep.subr.mxu1 %v5288_v15 }
 0xe06   :  { %4846 = vmatmul.mubr.msk.f32.vlgmr.msra.gmra.mrb[46].mxu1 %vm320_vm2, %v2390_v20  ;;  %v2724_v29 = vpop.permute.xlu0 %2723 }
 0xe07   :  { %4849 = vmatpush3.xpose.msk.msra.mxu0 %vm320_vm2, %v2724_v29  ;;  %4855 = vmatprep.mubr.msk.f32.mxu1 %vm5289_vm1, %v5288_v15 }
 0xe08   :  { %4858 = vmatprep.subr.mxu0 %v5288_v15 }
 0xe0a   :  { %v2800_v31 = vpop.permute.xlu1 %2799  ;;  %4851 = vmatmul.mubr.msk.f32.vlgmr.msra.gmra.mrb[14].mxu0 %vm320_vm2, %v2392_v22  ;;  %v2876_v32 = vpop.permute.xlu0 %2875 }
 0xe0b   :  { %4854 = vmatpush3.xpose.msk.msra.mxu1 %vm320_vm2, %v2800_v31  ;;  %4859 = vmatpush3.xpose.msk.msra.mxu0 %vm320_vm2, %v2876_v32 }
 0xe0c   :  { %4860 = vmatprep.mubr.msk.f32.mxu0 %vm5289_vm1, %v5288_v15  ;;  %4863 = vmatprep.subr.mxu1 %v5288_v15 }
 0xe0d   :  { %4868 = vmatprep.subr.mxu0 %v5288_v15 }
 0xe0e   :  { %v2952_v34 = vpop.permute.xlu1 %2951  ;;  %4856 = vmatmul.mubr.msk.f32.vlgmr.msra.gmra.mrb[48].mxu1 %vm320_vm2, %v2394_v24  ;;  %4861 = vmatmul.mubr.msk.f32.vlgmr.msra.gmra.mrb[16].mxu0 %vm320_vm2, %v2396_v21 }
 0xe0f   :  { %4864 = vmatpush3.xpose.msk.msra.mxu1 %vm320_vm2, %v2952_v34  ;;  %4869 = vmatpush3.msra.mxu0 %v6001_v33 }
 0xe10   :  { %4865 = vmatprep.mubr.msk.f32.mxu1 %vm5289_vm1, %v5288_v15  ;;  %4873 = vmatprep.subr.mxu1 %v5288_v15 }
 0xe11   :  { %4870 = vmatprep.mubr.msk.f32.mxu0 %vm5289_vm1, %v5288_v15  ;;  %4878 = vmatprep.subr.mxu0 %v5288_v15 }
 0xe12   :  { %4866 = vmatmul.mubr.msk.f32.vlgmr.msra.gmra.mrb[50].mxu1 %vm320_vm2, %v2398_v25 }
 0xe13   :  { %4874 = vmatpush3.msra.mxu1 %v6011_v35  ;;  %4875 = vmatprep.mubr.msk.f32.mxu1 %vm5289_vm1, %v5288_v15 }
 0xe14   :  { %4883 = vmatprep.subr.mxu1 %v5288_v15 }
 0xe6a   :  { %v2491_v36 = vpop.f32.mrb[40].mxu1 }
 0xe6b   :  { %v3027_v37 = vmul.f32 0.25, %v2491_v36  ;;  %v4832_v40 = vpop.f32.mrb[41].mxu1 }
 0xe6d   :  { %v3035_v45 = vadd.f32 %v3027_v37, %v5584_v6 }
 0xe6f   :  { %v3043_v46 = vsel %vm943_vm4, %v3035_v45, -inf }
 0xe70   :  { %3044 = vmax.xlane.f32.xlu0 %v3043_v46 }
 0xe76   :  { %v2567_v48 = vpop.f32.mrb[42].mxu1 }
 0xe77   :  { %v3028_v49 = vmul.f32 0.25, %v2567_v48  ;;  %v4837_v50 = vpop.f32.mrb[43].mxu1 }
 0xe79   :  { %v3036_v52 = vadd.f32 %v3028_v49, %v5584_v6 }
 0xe7b   :  { %v3046_v3 = vsel %vm943_vm4, %v3036_v52, -inf }
 0xe7c   :  { %3047 = vmax.xlane.f32.xlu1 %v3046_v3 }
 0xed5   :  { %v2643_v51 = vpop.f32.mrb[44].mxu1 }
 0xed6   :  { %v3029_v53 = vmul.f32 0.25, %v2643_v51  ;;  %v4842_v54 = vpop.f32.mrb[45].mxu1 }
 0xed8   :  { %v3037_v55 = vadd.f32 %v3029_v53, %v5584_v6 }
 0xed9   :  { %v2719_v56 = vpop.f32.mrb[46].mxu1 }
 0xeda   :  { %v3030_v57 = vmul.f32 0.25, %v2719_v56  ;;  %v4847_v43 = vpop.f32.mrb[47].mxu1  ;;  %v3049_v58 = vsel %vm943_vm4, %v3037_v55, -inf }
 0xedb   :  { %3050 = vmax.xlane.f32.xlu0 %v3049_v58 }
 0xedc   :  { %v3038_v59 = vadd.f32 %v3030_v57, %v5584_v6 }
 0xedd   :  { %v2795_v47 = vpop.f32.mrb[14].mxu0 }
 0xede   :  { %v3031_v60 = vmul.f32 0.25, %v2795_v47  ;;  %v4852_v61 = vpop.f32.mrb[15].mxu0  ;;  %v3052_v62 = vsel %vm943_vm4, %v3038_v59, -inf }
 0xedf   :  { %3053 = vmax.xlane.f32.xlu0 %v3052_v62 }
 0xee0   :  { %v3039_v63 = vadd.f32 %v3031_v60, %v5584_v6 }
 0xee1   :  { %v2871_v0 = vpop.f32.mrb[48].mxu1  ;;  %v2947_v1 = vpop.f32.mrb[16].mxu0 }
 0xee2   :  { %v3032_v2 = vmul.f32 0.25, %v2871_v0  ;;  %v3033_v5 = vmul.f32 0.25, %v2947_v1  ;;  %v4857_v7 = vpop.f32.mrb[49].mxu1  ;;  %v4862_v8 = vpop.f32.mrb[17].mxu0  ;;  %v3055_v10 = vsel %vm943_vm4, %v3039_v63, -inf }
 0xee3   :  { %3056 = vmax.xlane.f32.xlu0 %v3055_v10 }
 0xee4   :  { %v3040_v11 = vadd.f32 %v3032_v2, %v5584_v6  ;;  %v3041_v12 = vadd.f32 %v3033_v5, %v5584_v6 }
 0xee5   :  { %v3023_v13 = vpop.f32.mrb[50].mxu1 }
 0xee6   :  { %v3034_v14 = vmul.f32 0.25, %v3023_v13  ;;  %v4867_v38 = vpop.f32.mrb[51].mxu1  ;;  %v3058_v42 = vsel %vm943_vm4, %v3040_v11, -inf  ;;  %v3061_v16 = vsel %vm943_vm4, %v3041_v12, -inf }
 0xee7   :  { %3059 = vmax.xlane.f32.xlu1 %v3058_v42  ;;  %3062 = vmax.xlane.f32.xlu0 %v3061_v16 }
 0xee8   :  { %v3042_v17 = vadd.f32 %v3034_v14, %v5584_v6 }
 0xeea   :  { %v3064_v18 = vsel %vm943_vm4, %v3042_v17, -inf }
 0xeeb   :  { %3065 = vmax.xlane.f32.xlu1 %v3064_v18 }
 0xefd   :  { %v3045_v19 = vpop.xlane.xlu0 %3044 }
 0xefe   :  { %v3067_v41 = vsub.f32 %v3035_v45, %v3045_v19 }
 0xf00   :  { %v3075_v20 = vmul.f32 1.442695, %v3067_v41 }
 0xf02   :  { %5239 = vpow2.f32 %v3075_v20 }
 0xf09   :  { %v3048_v21 = vpop.xlane.xlu1 %3047 }
 0xf0a   :  { %v3068_v22 = vsub.f32 %v3036_v52, %v3048_v21 }
 0xf0c   :  { %v5240_v23 = vpop.eup %5239  ;;  %v3077_v24 = vmul.f32 1.442695, %v3068_v22 }
 0xf0d   :  { %v3091_v25 = vsel %vm943_vm4, %v5240_v23, 0.0 }
 0xf0e   :  { %5241 = vpow2.f32 %v3077_v24  ;;  %3092 = vadd.xlane.f32.xlu0 %v3091_v25 }
 0xf18   :  { %v5242_v26 = vpop.eup %5241 }
 0xf19   :  { %v3094_v27 = vsel %vm943_vm4, %v5242_v26, 0.0 }
 0xf1a   :  { %3095 = vadd.xlane.f32.xlu1 %v3094_v27 }
 0xf2b   :  { %2403 = vrot.lane.b32.xlu1 %v6011_v35, %s5290_s12 }
 0xf2f   :  { %2407 = vrot.lane.b32.xlu1 %v6001_v33, %s5293_s15 }
 0xf68   :  { %v3051_v6 = vpop.xlane.xlu0 %3050 }
 0xf69   :  { %v3069_v28 = vsub.f32 %v3037_v55, %v3051_v6 }
 0xf6b   :  { %v3079_v29 = vmul.f32 1.442695, %v3069_v28  ;;  %v3717_v28 = vld [vmem:[%s6353_s1 + $0x210] sm:$0xff] }
 0xf6c   :  { %v3054_v30 = vpop.xlane.xlu0 %3053 }
 0xf6d   :  { %5243 = vpow2.f32 %v3079_v29  ;;  %v3070_v31 = vsub.f32 %v3038_v59, %v3054_v30  ;;  %v3718_v29 = vld [vmem:[%s6353_s1 + $0x218] sm:$0xff] }
 0xf6e   :  { %v5087_v30 = vpack.c.bf16 %v3718_v29, %v3717_v28  ;;  %v4096_v29 = vld [vmem:[%s6357_s3 + $0xc0] sm:$0xff] }
 0xf6f   :  { %v3081_v32 = vmul.f32 1.442695, %v3070_v31  ;;  %v3715_v31 = vld [vmem:[%s6353_s1 + $0x200] sm:$0xff] }
 0xf70   :  { %v3057_v45 = vpop.xlane.xlu0 %3056 }
 0xf71   :  { %5245 = vpow2.f32 %v3081_v32  ;;  %v3071_v49 = vsub.f32 %v3039_v63, %v3057_v45  ;;  %v3716_v32 = vld [vmem:[%s6353_s1 + $0x208] sm:$0xff] }
 0xf73   :  { %v3083_v3 = vmul.f32 1.442695, %v3071_v49  ;;  %v3720_v49 = vld [vmem:[%s6353_s1 + $0x228] sm:$0xff] }
 0xf74   :  { %v3060_v46 = vpop.xlane.xlu1 %3059  ;;  %v3063_v48 = vpop.xlane.xlu0 %3062 }
 0xf75   :  { %v3072_v50 = vsub.f32 %v3040_v11, %v3060_v46  ;;  %v3073_v51 = vsub.f32 %v3041_v12, %v3063_v48  ;;  %v3719_v48 = vld [vmem:[%s6353_s1 + $0x220] sm:$0xff] }
 0xf77   :  { %v5244_v34 = vpop.eup %5243  ;;  %v3085_v54 = vmul.f32 1.442695, %v3072_v50  ;;  %v3087_v56 = vmul.f32 1.442695, %v3073_v51 }
 0xf78   :  { %v3097_v36 = vsel %vm943_vm4, %v5244_v34, 0.0  ;;  %v3066_v53 = vpop.xlane.xlu1 %3065 }
 0xf79   :  { %3098 = vadd.xlane.f32.xlu0 %v3097_v36  ;;  %v3074_v55 = vsub.f32 %v3042_v17, %v3066_v53  ;;  %v3721_v53 = vld [vmem:[%s6353_s1 + $0x230] sm:$0xff] }
 0xf7b   :  { %v6044_v37 = vpop.eup %5245  ;;  %v3089_v57 = vmul.f32 1.442695, %v3074_v55 }
 0xf7c   :  { %v3100_v40 = vsel %vm943_vm4, %v6044_v37, 0.0 }
 0xf7d   :  { %3101 = vadd.xlane.f32.xlu1 %v3100_v40 }
 0xf8e   :  { %2409 = vrot.lane.b32.xlu1 %v6011_v35, %s5293_s15 }
 0xf8f   :  { %2401 = vrot.lane.b32.xlu0 %v6001_v33, %s5290_s12 }
 0xf9b   :  { %v3093_v52 = vpop.xlane.xlu0 %3092 }
 0xf9c   :  { %5247 = vrcp.f32 %v3093_v52  ;;  %v5095_v52 = vpack.c.bf16 %v3720_v49, %v3719_v48  ;;  %v4237_v48 = vld [vmem:[%s6353_s1 + $0x2c8] sm:$0xff]  ;;  %v4220_v49 = vld [vmem:[%s6353_s1 + $0x240] sm:$0xff] }
 0xf9d   :  { %5249 = vpow2.f32 %v3083_v3 }
 0xf9e   :  { %5251 = vpow2.f32 %v3085_v54  ;;  %v3722_v54 = vld [vmem:[%s6353_s1 + $0x238] sm:$0xff] }
 0xf9f   :  { %5253 = vpow2.f32 %v3087_v56  ;;  %v5099_v55 = vpack.c.bf16 %v3722_v54, %v3721_v53 }
 0xfa0   :  { %5255 = vpow2.f32 %v3089_v57 }
 0xfa6   :  { %v5248_v43 = vpop.eup %5247 }
 0xfa7   :  { %v3123_v58 = vmul.f32 %v5248_v43, %v5240_v23  ;;  %v3096_v59 = vpop.xlane.xlu1 %3095  ;;  %v5250_v47 = vpop.eup %5249 }
 0xfa8   :  { %5257 = vrcp.f32 %v3096_v59  ;;  %v5252_v60 = vpop.eup %5251  ;;  %v3103_v61 = vsel %vm943_vm4, %v5250_v47, 0.0 }
 0xfa9   :  { %4871 = vmatmul.mubr.msk.f32.vlgmr.msra.gmra.mrb[18].mxu0 %vm943_vm4, %v3123_v58  ;;  %v5254_v62 = vpop.eup %5253  ;;  %v3106_v0 = vsel %vm943_vm4, %v5252_v60, 0.0 }
 0xfaa   :  { %4880 = vmatprep.mubr.msk.f32.mxu0 %vm5289_vm1, %v5288_v15  ;;  %v5256_v63 = vpop.eup %5255  ;;  %v3109_v1 = vsel %vm943_vm4, %v5254_v62, 0.0 }
 0xfab   :  { %v2404_v7 = vpop.permute.xlu1 %2403  ;;  %v3112_v8 = vsel %vm943_vm4, %v5256_v63, 0.0 }
 0xfae   :  { %3104 = vadd.xlane.f32.xlu0 %v3103_v61 }
 0xfaf   :  { %v2408_v10 = vpop.permute.xlu1 %2407 }
 0xfb2   :  { %v5258_v2 = vpop.eup %5257  ;;  %3107 = vadd.xlane.f32.xlu1 %v3106_v0  ;;  %3110 = vadd.xlane.f32.xlu0 %v3109_v1 }
 0xfb3   :  { %v3124_v5 = vmul.f32 %v5258_v2, %v5242_v26 }
 0xfb5   :  { %4876 = vmatmul.mubr.msk.f32.vlgmr.msra.gmra.mrb[52].mxu1 %vm943_vm4, %v3124_v5 }
 0xfb6   :  { %4884 = vmatpush3.msra.mxu1 %v2404_v7  ;;  %3113 = vadd.xlane.f32.xlu1 %v3112_v8 }
 0xfb7   :  { %4885 = vmatprep.mubr.msk.f32.mxu1 %vm5289_vm1, %v5288_v15  ;;  %4893 = vmatprep.subr.mxu1 %v5288_v15 }
 0xfc7   :  { %2415 = vrot.lane.b32.xlu1 %v6011_v35, %s5291_s13 }
 0xfc8   :  { %2413 = vrot.lane.b32.xlu0 %v6001_v33, %s5291_s13 }
0x1006   :  { %v3099_v11 = vpop.xlane.xlu0 %3098 }
0x1007   :  { %5259 = vrcp.f32 %v3099_v11 }
0x100a   :  { %v3102_v12 = vpop.xlane.xlu1 %3101  ;;  %v2402_v13 = vpop.permute.xlu0 %2401 }
0x100b   :  { %5261 = vrcp.f32 %v3102_v12  ;;  %4879 = vmatpush3.msra.mxu0 %v2402_v13 }
0x100c   :  { %4888 = vmatprep.subr.mxu0 %v5288_v15 }
0x100e   :  { %v2410_v35 = vpop.permute.xlu1 %2409 }
0x1011   :  { %v5260_v14 = vpop.eup %5259 }
0x1012   :  { %v3125_v38 = vmul.f32 %v5260_v14, %v5244_v34  ;;  %v5091_v34 = vpack.c.bf16 %v3716_v32, %v3715_v31  ;;  %v4101_v32 = vld [vmem:[%s6357_s3 + $0xe8] sm:$0xff] }
0x1014   :  { %4881 = vmatmul.mubr.msk.f32.vlgmr.msra.gmra.mrb[20].mxu0 %vm943_vm4, %v3125_v38 }
0x1015   :  { %v5262_v42 = vpop.eup %5261  ;;  %4889 = vmatpush3.msra.mxu0 %v2408_v10  ;;  %4890 = vmatprep.mubr.msk.f32.mxu0 %vm5289_vm1, %v5288_v15 }
0x1016   :  { %v3126_v33 = vmul.f32 %v5262_v42, %v6044_v37  ;;  %4898 = vmatprep.subr.mxu0 %v5288_v15 }
0x1018   :  { %4886 = vmatmul.mubr.msk.f32.vlgmr.msra.gmra.mrb[54].mxu1 %vm943_vm4, %v3126_v33 }
0x1019   :  { %4894 = vmatpush3.msra.mxu1 %v2410_v35  ;;  %4895 = vmatprep.mubr.msk.f32.mxu1 %vm5289_vm1, %v5288_v15 }
0x101a   :  { %4903 = vmatprep.subr.mxu1 %v5288_v15 }
0x103b   :  { %v3105_v16 = vpop.xlane.xlu0 %3104 }
0x103c   :  { %5263 = vrcp.f32 %v3105_v16  ;;  %v4089_v16 = vld [vmem:[%s6357_s3 + $0x88] sm:$0xff] }
0x103f   :  { %v3108_v17 = vpop.xlane.xlu1 %3107  ;;  %v3111_v18 = vpop.xlane.xlu0 %3110 }
0x1040   :  { %5265 = vrcp.f32 %v3108_v17  ;;  %v4091_v17 = vld [vmem:[%s6357_s3 + $0x98] sm:$0xff] }
0x1041   :  { %5267 = vrcp.f32 %v3111_v18  ;;  %v5103_v18 = vpack.c.bf16 %v4091_v17, %v4089_v16  ;;  %v4243_v17 = vld [vmem:[%s6353_s1 + $0x2f8] sm:$0xff] }
0x1043   :  { %v3114_v19 = vpop.xlane.xlu1 %3113  ;;  %v2414_v21 = vpop.permute.xlu0 %2413 }
0x1044   :  { %5269 = vrcp.f32 %v3114_v19  ;;  %v4088_v19 = vld [vmem:[%s6357_s3 + $0x80] sm:$0xff] }
0x1046   :  { %v5264_v41 = vpop.eup %5263 }
0x1047   :  { %v3127_v20 = vmul.f32 %v5264_v41, %v5250_v47  ;;  %v2416_v26 = vpop.permute.xlu1 %2415  ;;  %v4090_v41 = vld [vmem:[%s6357_s3 + $0x90] sm:$0xff] }
0x1049   :  { %4891 = vmatmul.mubr.msk.f32.vlgmr.msra.gmra.mrb[22].mxu0 %vm943_vm4, %v3127_v20  ;;  %v5105_v20 = vpack.c.bf16 %v4090_v41, %v4088_v19  ;;  %v4244_v41 = vld [vmem:[%s6353_s1 + $0x300] sm:$0xff] }
0x104a   :  { %v5266_v22 = vpop.eup %5265  ;;  %4899 = vmatpush3.msra.mxu0 %v2414_v21  ;;  %4900 = vmatprep.mubr.msk.f32.mxu0 %vm5289_vm1, %v5288_v15  ;;  %v4093_v21 = vld [vmem:[%s6357_s3 + $0xa8] sm:$0xff] }
0x104b   :  { %v5268_v23 = vpop.eup %5267  ;;  %v3128_v24 = vmul.f32 %v5266_v22, %v5252_v60  ;;  %5088 = vmatprep.subr.bf16.mxu0 %v5087_v30  ;;  %v4095_v22 = vld [vmem:[%s6357_s3 + $0xb8] sm:$0xff] }
0x104c   :  { %v3129_v25 = vmul.f32 %v5268_v23, %v5254_v62  ;;  %v5107_v23 = vpack.c.bf16 %v4095_v22, %v4093_v21  ;;  %v4228_v22 = vld [vmem:[%s6353_s1 + $0x280] sm:$0xff] }
0x104d   :  { %4896 = vmatmul.mubr.msk.f32.vlgmr.msra.gmra.mrb[56].mxu1 %vm943_vm4, %v3128_v24  ;;  %v4092_v24 = vld [vmem:[%s6357_s3 + $0xa0] sm:$0xff] }
0x104e   :  { %v5270_v27 = vpop.eup %5269  ;;  %4901 = vmatmul.mubr.msk.f32.vlgmr.msra.gmra.mrb[24].mxu0 %vm943_vm4, %v3129_v25  ;;  %4904 = vmatpush3.msra.mxu1 %v2416_v26  ;;  %v4094_v25 = vld [vmem:[%s6357_s3 + $0xb0] sm:$0xff] }
0x104f   :  { %v3130_v6 = vmul.f32 %v5270_v27, %v5256_v63  ;;  %4905 = vmatprep.mubr.msk.f32.mxu1 %vm5289_vm1, %v5288_v15  ;;  %5090 = vmatpush3.bf16.msra.mxu0 %v5087_v30  ;;  %v4053_v63 = vld [vmem:[%s6355_s4 + $0x23] ss:$0 sm:$0xff]  ;;  %v5109_v26 = vpack.c.bf16 %v4094_v25, %v4092_v24  ;;  %v4097_v27 = vld [vmem:[%s6357_s3 + $0xc8] sm:$0xff]  ;;  %v4098_v30 = vld [vmem:[%s6357_s3 + $0xd0] sm:$0xff] }
0x1050   :  { %5092 = vmatprep.subr.bf16.mxu0 %v5091_v34  ;;  %5104 = vmatprep.subr.bf16.mxu1 %v5103_v18  ;;  %v5113_v31 = vpack.c.bf16 %v4098_v30, %v4096_v29  ;;  %v4246_v25 = vld [vmem:[%s6353_s1 + $0x310] sm:$0xff]  ;;  %v4248_v30 = vld [vmem:[%s6353_s1 + $0x320] sm:$0xff] }
0x1051   :  { %4906 = vmatmul.mubr.msk.f32.vlgmr.msra.gmra.mrb[58].mxu1 %vm943_vm4, %v3130_v6  ;;  %v4099_v6 = vld [vmem:[%s6357_s3 + $0xd8] sm:$0xff] }
0x1052   :  { %4187 = vmatprep.mubr.f32.mxu1 %v5288_v15  ;;  %5106 = vmatpush1.bf16.msra.mxu1 %v5105_v20  ;;  %v5111_v28 = vpack.c.bf16 %v4099_v6, %v4097_v27  ;;  %v4245_v20 = vld [vmem:[%s6353_s1 + $0x308] sm:$0xff]  ;;  %v4230_v6 = vld [vmem:[%s6353_s1 + $0x290] sm:$0xff] }
0x1053   :  { %5108 = vmatprep.subr.bf16.mxu1 %v5107_v23  ;;  %v5135_v21 = vpack.c.bf16 %v4245_v20, %v4244_v41  ;;  %v4229_v23 = vld [vmem:[%s6353_s1 + $0x288] sm:$0xff] }
0x1054   :  { %v5137_v24 = vpack.c.bf16 %v4229_v23, %v4228_v22 }
0x1056   :  { %5110 = vmatpush1.bf16.msra.mxu1 %v5109_v26  ;;  %v4247_v26 = vld [vmem:[%s6353_s1 + $0x318] sm:$0xff] }
0x1057   :  { %5112 = vmatprep.subr.bf16.mxu1 %v5111_v28  ;;  %v5139_v27 = vpack.c.bf16 %v4247_v26, %v4246_v25  ;;  %v4231_v28 = vld [vmem:[%s6353_s1 + $0x298] sm:$0xff] }
0x1058   :  { %v5141_v29 = vpack.c.bf16 %v4231_v28, %v4230_v6 }
0x105a   :  { %5114 = vmatpush1.bf16.msra.mxu1 %v5113_v31  ;;  %v4249_v31 = vld [vmem:[%s6353_s1 + $0x328] sm:$0xff] }
0x107c   :  { %v3200_v36 = vpop.f32.mrb[18].mxu0 }
0x107d   :  { %v4872_v37 = vpop.f32.mrb[19].mxu0 }
0x1088   :  { %v3273_v40 = vpop.f32.mrb[52].mxu1 }
0x1089   :  { %v4877_v45 = vpop.f32.mrb[53].mxu1 }
0x10e7   :  { %v3346_v46 = vpop.f32.mrb[20].mxu0 }
0x10e8   :  { %v4882_v50 = vpop.f32.mrb[21].mxu0  ;;  %4912 = vmatprep.mubr.msk.f32.mxu0 %vm320_vm2, %v3346_v46  ;;  %v4236_v46 = vld [vmem:[%s6353_s1 + $0x2c0] sm:$0xff] }
0x10e9   :  { %v5119_v50 = vpack.c.bf16 %v4237_v48, %v4236_v46  ;;  %v4234_v48 = vld [vmem:[%s6353_s1 + $0x2b0] sm:$0xff] }
0x10eb   :  { %v3419_v3 = vpop.f32.mrb[54].mxu1 }
0x10ec   :  { %v4887_v51 = vpop.f32.mrb[55].mxu1  ;;  %4913 = vmatmul.mubr.msk.f32.vlgmr.msra.gmra.mrb[26].mxu0 %vm320_vm2, %v3419_v3  ;;  %v4238_v3 = vld [vmem:[%s6353_s1 + $0x2d0] sm:$0xff] }
0x10ed   :  { %4919 = vmatprep.mubr.msk.f32.mxu0 %vm320_vm2, %v3200_v36  ;;  %5094 = vmatpush3.bf16.msra.mxu0 %v5091_v34  ;;  %v4103_v34 = vld [vmem:[%s6357_s3 + $0xf8] sm:$0xff]  ;;  %v4100_v36 = vld [vmem:[%s6357_s3 + $0xe0] sm:$0xff] }
0x10ee   :  { %5096 = vmatprep.subr.bf16.mxu0 %v5095_v52  ;;  %v5115_v37 = vpack.c.bf16 %v4103_v34, %v4101_v32  ;;  %v4239_v51 = vld [vmem:[%s6353_s1 + $0x2d8] sm:$0xff]  ;;  %v5143_v32 = vpack.c.bf16 %v4249_v31, %v4248_v30  ;;  %v4232_v34 = vld [vmem:[%s6353_s1 + $0x2a0] sm:$0xff] }
0x10ef   :  { %v5123_v54 = vpack.c.bf16 %v4239_v51, %v4238_v3 }
0x10f0   :  { %5116 = vmatprep.subr.bf16.mxu1 %v5115_v37 }
0x10f4   :  { %4920 = vmatmul.mubr.msk.f32.vlgmr.msra.gmra.mrb[26].mxu0 %vm320_vm2, %v3273_v40  ;;  %v4102_v40 = vld [vmem:[%s6357_s3 + $0xf0] sm:$0xff] }
0x10f5   :  { %5098 = vmatpush3.bf16.msra.mxu0 %v5095_v52  ;;  %v5117_v45 = vpack.c.bf16 %v4102_v40, %v4100_v36  ;;  %v4221_v52 = vld [vmem:[%s6353_s1 + $0x248] sm:$0xff]  ;;  %v4250_v40 = vld [vmem:[%s6353_s1 + $0x330] sm:$0xff] }
0x10f6   :  { %5100 = vmatprep.subr.bf16.mxu0 %v5099_v55  ;;  %v5121_v53 = vpack.c.bf16 %v4221_v52, %v4220_v49  ;;  %v4233_v36 = vld [vmem:[%s6353_s1 + $0x2a8] sm:$0xff]  ;;  %v4235_v49 = vld [vmem:[%s6353_s1 + $0x2b8] sm:$0xff] }
0x10f7   :  { %5118 = vmatpush1.bf16.msra.mxu1 %v5117_v45  ;;  %v5145_v37 = vpack.c.bf16 %v4233_v36, %v4232_v34  ;;  %v4251_v45 = vld [vmem:[%s6353_s1 + $0x338] sm:$0xff]  ;;  %v4533_v52 = vld [vmem:[%s6355_s4 + $0x26] ss:$8 sm:$0x3]  ;;  %v4363_v34 = vld [vmem:[%s6355_s4 + $0x50] sm:$0xff] }
0x10f8   :  { %v5147_v46 = vpack.c.bf16 %v4251_v45, %v4250_v40  ;;  %v4110_v3 = vrot.slane %v4533_v52, %v5502_v39  ;;  %v4114_v51 = vrot.slane %v4533_v52, %v5513_v44  ;;  %v4365_v40 = vld [vmem:[%s6355_s4 + $0x70] sm:$0xff] }
0x10f9   :  { %v4369_v52 = vld [vmem:[%s6355_s4 + $0xb0] sm:$0xff] }
0x111c   :  { %v3492_v56 = vpop.f32.mrb[22].mxu0 }
0x111d   :  { %v4892_v57 = vpop.f32.mrb[23].mxu0  ;;  %4926 = vmatprep.mubr.msk.f32.mxu0 %vm320_vm2, %v3492_v56  ;;  %v4223_v56 = vld [vmem:[%s6353_s1 + $0x258] sm:$0xff] }
0x111e   :  { %v4240_v57 = vld [vmem:[%s6353_s1 + $0x2e0] sm:$0xff] }
0x1120   :  { %v3565_v43 = vpop.f32.mrb[56].mxu1 }
0x1121   :  { %v3638_v58 = vpop.f32.mrb[24].mxu0  ;;  %v4897_v59 = vpop.f32.mrb[57].mxu1  ;;  %4927 = vmatmul.mubr.msk.f32.vlgmr.msra.gmra.mrb[26].mxu0 %vm320_vm2, %v3565_v43  ;;  %v4241_v43 = vld [vmem:[%s6353_s1 + $0x2e8] sm:$0xff] }
0x1122   :  { %v4902_v47 = vpop.f32.mrb[25].mxu0  ;;  %5102 = vmatpush3.bf16.msra.mxu0 %v5099_v55  ;;  %4933 = vmatprep.mubr.msk.f32.mxu0 %vm320_vm2, %v3638_v58  ;;  %v4222_v55 = vld [vmem:[%s6353_s1 + $0x250] sm:$0xff]  ;;  %v5127_v59 = vpack.c.bf16 %v4241_v43, %v4240_v57 }
0x1123   :  { %5120 = vmatprep.subr.bf16.mxu0 %v5119_v50  ;;  %v5125_v58 = vpack.c.bf16 %v4223_v56, %v4222_v55  ;;  %v4224_v47 = vld [vmem:[%s6353_s1 + $0x260] sm:$0xff]  ;;  %v5149_v50 = vpack.c.bf16 %v4235_v49, %v4234_v48  ;;  %v4367_v48 = vld [vmem:[%s6355_s4 + $0x90] sm:$0xff] }
0x1124   :  { %v3711_v60 = vpop.f32.mrb[58].mxu1 }
0x1125   :  { %v4907_v61 = vpop.f32.mrb[59].mxu1 }
0x1129   :  { %4934 = vmatmul.mubr.msk.f32.vlgmr.msra.gmra.mrb[26].mxu0 %vm320_vm2, %v3711_v60  ;;  %v4225_v60 = vld [vmem:[%s6353_s1 + $0x268] sm:$0xff] }
0x112a   :  { %5122 = vmatpush3.bf16.msra.mxu0 %v5121_v53  ;;  %v5129_v61 = vpack.c.bf16 %v4225_v60, %v4224_v47 }
0x112b   :  { %5124 = vmatprep.subr.bf16.mxu0 %v5123_v54 }
0x112e   :  { %5126 = vmatpush3.bf16.msra.mxu0 %v5125_v58 }
0x112f   :  { %5128 = vmatprep.subr.bf16.mxu0 %v5127_v59 }
0x1132   :  { %5130 = vmatpush3.bf16.msra.mxu0 %v5129_v61 }
0x11fc   :  { %v4935_v62 = vpop.f32.mrb[26].mxu0 }
0x11fd   :  { %v4052_v0 = vadd.f32 %v4935_v62, %v5883_v9  ;;  %v4040_v1 = vpop.f32.mrb[27].mxu0 }
0x11fe   :  { %v4051_v2 = vadd.f32 %v4040_v1, %v5878_v4 }
0x11ff   :  { %v6123_v5 = vadd.f32 %v4053_v63, %v4052_v0 }
0x1200   :  { %v6125_v7 = vadd.f32 %v4053_v63, %v4051_v2 }
0x1201   :  { %v4061_v8 = vsel %vm48_vm0, %v6123_v5, 0.0 }
0x1202   :  { %4062 = vadd.xlane.f32.xlu1 %v4061_v8  ;;  %v4058_v10 = vsel %vm48_vm0, %v6125_v7, 0.0 }
0x1203   :  { %4059 = vadd.xlane.f32.xlu0 %v4058_v10 }
0x128f   :  { %v4063_v11 = vpop.xlane.xlu1 %4062 }
0x1290   :  { %v4065_v12 = vmul.f32 0.015625, %v4063_v11  ;;  %v4060_v13 = vpop.xlane.xlu0 %4059  ;;  %v4056_v11 = vld [vmem:[%s6355_s4 + $0x24] ss:$0 sm:$0xff] }
0x1291   :  { %v4064_v14 = vmul.f32 0.015625, %v4060_v13  ;;  %v4057_v13 = vld [vmem:[%s6355_s4 + $0x25] ss:$0 sm:$0xff] }
0x1292   :  { %v6132_v9 = vsub.f32 %v6123_v5, %v4065_v12 }
0x1293   :  { %v6135_v4 = vsub.f32 %v6125_v7, %v4064_v14 }
0x1294   :  { %v4069_v33 = vmul.f32 %v6132_v9, %v6132_v9 }
0x1295   :  { %v4068_v38 = vmul.f32 %v6135_v4, %v6135_v4 }
0x1296   :  { %v4073_v35 = vsel %vm48_vm0, %v4069_v33, 0.0 }
0x1297   :  { %v4070_v42 = vsel %vm48_vm0, %v4068_v38, 0.0 }
0x1298   :  { %4071 = vadd.xlane.f32.xlu0 %v4070_v42 }
0x129c   :  { %4074 = vadd.xlane.f32.xlu0 %v4073_v35 }
0x1325   :  { %v4072_v62 = vpop.xlane.xlu0 %4071 }
0x1326   :  { %v4076_v63 = vmul.f32 0.015625, %v4072_v62 }
0x1328   :  { %v4078_v0 = vadd.f32 1e-06, %v4076_v63 }
0x1329   :  { %v4075_v1 = vpop.xlane.xlu0 %4074 }
0x132a   :  { %5271 = vrsqrt.f32 %v4078_v0  ;;  %v4077_v2 = vmul.f32 0.015625, %v4075_v1 }
0x132c   :  { %v4079_v8 = vadd.f32 1e-06, %v4077_v2 }
0x132e   :  { %5273 = vrsqrt.f32 %v4079_v8 }
0x1334   :  { %v5272_v10 = vpop.eup %5271 }
0x1335   :  { %v4082_v12 = vmul.f32 %v5272_v10, %v6135_v4  ;;  %v4242_v4 = vld [vmem:[%s6353_s1 + $0x2f0] sm:$0xff] }
0x1336   :  { %v5131_v18 = vpack.c.bf16 %v4243_v17, %v4242_v4  ;;  %v4252_v4 = vld [vmem:[%s6355_s4 + $0x27] ss:$0 sm:$0xff] }
0x1337   :  { %v4084_v14 = vmul.f32 %v4082_v12, %v4056_v11 }
0x1338   :  { %v5274_v38 = vpop.eup %5273  ;;  %5132 = vmatprep.subr.bf16.mxu0 %v5131_v18 }
0x1339   :  { %v4086_v42 = vadd.f32 %v4084_v14, %v4057_v13  ;;  %v4083_v33 = vmul.f32 %v5274_v38, %v6132_v9  ;;  %v4226_v9 = vld [vmem:[%s6353_s1 + $0x270] sm:$0xff] }
0x133b   :  { %4534 = vmatmul.mubr.msk.f32.vlgmr.msra.gmra.mrb[60].mxu1 %vm48_vm0, %v4086_v42  ;;  %v4085_v35 = vmul.f32 %v4083_v33, %v4056_v11 }
0x133c   :  { %4193 = vmatprep.mubr.f32.mxu1 %v5288_v15  ;;  %v4227_v15 = vld [vmem:[%s6353_s1 + $0x278] sm:$0xff] }
0x133d   :  { %v4087_v16 = vadd.f32 %v4085_v35, %v4057_v13  ;;  %v5133_v19 = vpack.c.bf16 %v4227_v15, %v4226_v9 }
0x133f   :  { %4535 = vmatmul.mubr.msk.f32.gmra.mrb[62].mxu1 %vm48_vm0, %v4087_v16  ;;  %5134 = vmatpush3.bf16.msra.mxu0 %v5133_v19 }
0x1340   :  { %5136 = vmatprep.subr.bf16.mxu0 %v5135_v21 }
0x1343   :  { %5138 = vmatpush3.bf16.msra.mxu0 %v5137_v24 }
0x1344   :  { %5140 = vmatprep.subr.bf16.mxu0 %v5139_v27 }
0x1347   :  { %5142 = vmatpush3.bf16.msra.mxu0 %v5141_v29 }
0x1348   :  { %5144 = vmatprep.subr.bf16.mxu0 %v5143_v32 }
0x134b   :  { %5146 = vmatpush3.bf16.msra.mxu0 %v5145_v37  ;;  %v4364_v37 = vld [vmem:[%s6355_s4 + $0x60] sm:$0xff] }
0x134c   :  { %5148 = vmatprep.subr.bf16.mxu0 %v5147_v46  ;;  %v5155_v45 = vpack.c.bf16 %v4365_v40, %v4364_v37  ;;  %v4366_v46 = vld [vmem:[%s6355_s4 + $0x80] sm:$0xff] }
0x134d   :  { %v5159_v49 = vpack.c.bf16 %v4367_v48, %v4366_v46 }
0x134f   :  { %5150 = vmatpush3.bf16.msra.mxu0 %v5149_v50  ;;  %v4368_v50 = vld [vmem:[%s6355_s4 + $0xa0] sm:$0xff] }
0x140e   :  { %v4189_v53 = vpop.f32.mrb[60].mxu1 }
0x140f   :  { %v4190_v54 = vadd.f32 %v4189_v53, %v4110_v3  ;;  %v4191_v55 = vpop.f32.mrb[61].mxu1 }
0x1410   :  { %v4192_v56 = vadd.f32 %v4191_v55, %v4114_v51 }
0x1411   :  { %v4204_v57 = vmul.f32 0.70710677, %v4190_v54  ;;  %v4200_v2 = vmul.f32 0.5, %v4190_v54 }
0x1412   :  { %v4205_v43 = vmul.f32 0.70710677, %v4192_v56  ;;  %v4195_v58 = vpop.f32.mrb[62].mxu1  ;;  %v4201_v44 = vmul.f32 0.5, %v4192_v56 }
0x1413   :  { %5275 = verf.f32 %v4204_v57  ;;  %v4196_v59 = vadd.f32 %v4195_v58, %v4110_v3  ;;  %v4197_v47 = vpop.f32.mrb[63].mxu1  ;;  %v5163_v3 = vpack.c.bf16 %v4369_v52, %v4368_v50  ;;  %v4330_v58 = vld [vmem:[%s6355_s4 + $0x30] ss:$0 sm:$0xff] }
0x1414   :  { %5277 = verf.f32 %v4205_v43  ;;  %v4198_v60 = vadd.f32 %v4197_v47, %v4114_v51  ;;  %v4331_v47 = vld [vmem:[%s6355_s4 + $0x31] ss:$0 sm:$0xff] }
0x1415   :  { %v4206_v61 = vmul.f32 0.70710677, %v4196_v59  ;;  %v4202_v42 = vmul.f32 0.5, %v4196_v59 }
0x1416   :  { %v4207_v62 = vmul.f32 0.70710677, %v4198_v60  ;;  %v4203_v14 = vmul.f32 0.5, %v4198_v60 }
0x1417   :  { %5279 = verf.f32 %v4206_v61 }
0x1418   :  { %5281 = verf.f32 %v4207_v62 }
0x141d   :  { %v5276_v63 = vpop.eup %5275 }
0x141e   :  { %v5278_v39 = vpop.eup %5277  ;;  %v4212_v0 = vadd.f32 1.0, %v5276_v63 }
0x141f   :  { %v4213_v1 = vadd.f32 1.0, %v5278_v39 }
0x1420   :  { %v4216_v12 = vmul.f32 %v4212_v0, %v4200_v2 }
0x1421   :  { %v5280_v8 = vpop.eup %5279  ;;  %v4217_v10 = vmul.f32 %v4213_v1, %v4201_v44  ;;  %v4370_v44 = vld [vmem:[%s6355_s4 + $0x32] ss:$0 sm:$0xff] }
0x1422   :  { %v5282_v11 = vpop.eup %5281  ;;  %v4214_v13 = vadd.f32 1.0, %v5280_v8 }
0x1423   :  { %v4215_v38 = vadd.f32 1.0, %v5282_v11  ;;  %4317 = vmatprep.mubr.f32.mxu0 %v4217_v10 }
0x1424   :  { %4318 = vmatmul.mubr.f32.vlgmr.msra.gmra.mrb[28].mxu0 %v4216_v12  ;;  %v4218_v35 = vmul.f32 %v4214_v13, %v4202_v42 }
0x1425   :  { %v4219_v33 = vmul.f32 %v4215_v38, %v4203_v14 }
0x1427   :  { %4322 = vmatprep.mubr.f32.mxu0 %v4219_v33 }
0x1428   :  { %4323 = vmatmul.mubr.f32.gmra.mrb[30].mxu0 %v4218_v35 }
0x14f7   :  { %v4704_v16 = vpop.f32.mrb[28].mxu0 }
0x14f8   :  { %v4705_v17 = vpop.f32.mrb[29].mxu0 }
0x14f9   :  { %v4706_v18 = vadd.f32 %v4705_v17, %v4704_v16 }
0x14fb   :  { %v4320_v9 = vadd.f32 %v4706_v18, %v4252_v4  ;;  %v4707_v15 = vpop.f32.mrb[30].mxu0 }
0x14fc   :  { %v4708_v19 = vpop.f32.mrb[31].mxu0 }
0x14fd   :  { %v4709_v41 = vadd.f32 %v4708_v19, %v4707_v15  ;;  %v4328_v20 = vadd.f32 %v4320_v9, %v6125_v7 }
0x14ff   :  { %v4325_v21 = vadd.f32 %v4709_v41, %v4252_v4  ;;  %v4332_v22 = vsel %vm48_vm0, %v4328_v20, 0.0 }
0x1500   :  { %4333 = vadd.xlane.f32.xlu0 %v4332_v22 }
0x1501   :  { %v4329_v23 = vadd.f32 %v4325_v21, %v6123_v5  ;;  %v4362_v5 = vld [vmem:[%s6355_s4 + $0x40] sm:$0xff] }
0x1502   :  { %v5151_v36 = vpack.c.bf16 %v4363_v34, %v4362_v5 }
0x1503   :  { %v4335_v24 = vsel %vm48_vm0, %v4329_v23, 0.0 }
0x1504   :  { %4336 = vadd.xlane.f32.xlu1 %v4335_v24  ;;  %5152 = vmatprep.subr.bf16.mxu1 %v5151_v36 }
0x1505   :  { %5154 = vmatpush3.bf16.msra.mxu1 %v5151_v36 }
0x1506   :  { %5156 = vmatprep.subr.bf16.mxu1 %v5155_v45 }
0x1509   :  { %5158 = vmatpush3.bf16.msra.mxu1 %v5155_v45 }
0x150a   :  { %5160 = vmatprep.subr.bf16.mxu1 %v5159_v49 }
0x150d   :  { %5162 = vmatpush3.bf16.msra.mxu1 %v5159_v49 }
0x150e   :  { %5164 = vmatprep.subr.bf16.mxu1 %v5163_v3 }
0x1511   :  { %5166 = vmatpush3.bf16.msra.mxu1 %v5163_v3 }
0x158d   :  { %v4334_v25 = vpop.xlane.xlu0 %4333 }
0x158e   :  { %v4338_v26 = vmul.f32 0.015625, %v4334_v25 }
0x1590   :  { %v4340_v27 = vsub.f32 %v4328_v20, %v4338_v26 }
0x1591   :  { %v4337_v6 = vpop.xlane.xlu1 %4336 }
0x1592   :  { %v4339_v28 = vmul.f32 0.015625, %v4337_v6  ;;  %v4342_v29 = vmul.f32 %v4340_v27, %v4340_v27 }
0x1594   :  { %v4341_v30 = vsub.f32 %v4329_v23, %v4339_v28  ;;  %v4344_v31 = vsel %vm48_vm0, %v4342_v29, 0.0 }
0x1595   :  { %4345 = vadd.xlane.f32.xlu0 %v4344_v31 }
0x1596   :  { %v4343_v7 = vmul.f32 %v4341_v30, %v4341_v30 }
0x1598   :  { %v4347_v32 = vsel %vm48_vm0, %v4343_v7, 0.0 }
0x1599   :  { %4348 = vadd.xlane.f32.xlu1 %v4347_v32 }
0x1622   :  { %v4346_v51 = vpop.xlane.xlu0 %4345 }
0x1623   :  { %v4350_v53 = vmul.f32 0.015625, %v4346_v51 }
0x1625   :  { %v4352_v54 = vadd.f32 1e-06, %v4350_v53 }
0x1626   :  { %v4349_v55 = vpop.xlane.xlu1 %4348 }
0x1627   :  { %5283 = vrsqrt.f32 %v4352_v54  ;;  %v4351_v56 = vmul.f32 0.015625, %v4349_v55 }
0x1629   :  { %v4353_v57 = vadd.f32 1e-06, %v4351_v56 }
0x162b   :  { %5285 = vrsqrt.f32 %v4353_v57 }
0x1631   :  { %v5284_v43 = vpop.eup %5283 }
0x1632   :  { %v4356_v59 = vmul.f32 %v5284_v43, %v4340_v27 }
0x1634   :  { %v4358_v60 = vmul.f32 %v4356_v59, %v4330_v58 }
0x1635   :  { %v5286_v61 = vpop.eup %5285 }
0x1636   :  { %v4357_v62 = vmul.f32 %v5286_v61, %v4341_v30  ;;  %v4360_v63 = vadd.f32 %v4358_v60, %v4331_v47 }
0x1638   :  { %v4359_v39 = vmul.f32 %v4357_v62, %v4330_v58  ;;  %4952 = vmatprep.mubr.msk.f32.mxu1 %vm48_vm0, %v4360_v63 }
0x163a   :  { %v4361_v0 = vadd.f32 %v4359_v39, %v4331_v47 }
0x163c   :  { %4953 = vmatmul.mubr.msk.f32.vlgmr.msra.gmra.mrb[64].mxu1 %vm48_vm0, %v4361_v0 }
0x170f   :  { %v4954_v1 = vpop.f32.mrb[64].mxu1 }
0x1710   :  { %v4449_v2 = vadd.f32 %v4954_v1, %v4370_v44  ;;  %v4443_v8 = vpop.f32.mrb[65].mxu1 }
0x1711   :  { %v4444_v10 = vadd.f32 %v4443_v8, %v4370_v44 }
0x1712   :  { %4453 = vst [vmem:[%s6358_s5 + $0x8] sm:$0xff] %v4449_v2 }
0x1713   :  { %4452 = vst [vmem:[%s6358_s5] sm:$0xff] %v4444_v10 }

</bundles_post_ra>
